<compile_context>
chip_gen: v5e
topology: v5e:2x2
jax: 0.10.0
libtpu: 0.0.40
codegen_flags: <defaults>
</compile_context>

<pallas_src>
import functools
import math

import jax
import jax.numpy as jnp
from jax.experimental import pallas as pl
from jax.experimental.pallas import tpu as pltpu


PACK_W = 128  # lane width of the packed bias/LayerNorm parameter slab

# packed-row layout (per layer); widths are d_model unless noted
_BQ_S, _BK_S, _BV_S, _BO_S = 0, 1, 2, 3                      # self-attn biases
_BQ_C, _BK_C, _BV_C, _BO_C = 4, 5, 6, 7                      # cross-attn biases
_LN1_W, _LN1_B, _LN2_W, _LN2_B, _LN3_W, _LN3_B = 8, 9, 10, 11, 12, 13
_B1, _B2 = 14, 15                                            # FFN biases (b1: hidden_dim)
_N_PACK_ROWS = 16


# ----------------------------------------------------------------------------
# Fused kernel: one grid step = one decoder layer on one batch-half.
# ----------------------------------------------------------------------------
def decoder_stack_kernel(
    x0_ref, mem_ref,
    wq_s_ref, wk_s_ref, wv_s_ref, wo_s_ref,
    wq_c_ref, wk_c_ref, wv_c_ref, wo_c_ref,
    w1_ref, w2_ref, pk_ref,
    o_ref,
    *, n_heads, causal, bh, s_tgt, s_mem,
):
    l = pl.program_id(1)

    # Layer 0: seed the VMEM-resident activation (output block) with the
    # embedded input. The output block index is constant along the layer axis,
    # so it stays in VMEM across all layers and is written to HBM only once.
    @pl.when(l == 0)
    def _():
        o_ref[...] = x0_ref[...]

    x = o_ref[...]                              # [bh*s_tgt, D] f32
    D = x.shape[-1]
    dh = D // n_heads
    hidden = w1_ref.shape[-1]
    scale = 1.0 / math.sqrt(dh)

    pk = pk_ref[0]                              # [16, PACK_W] f32 (packed slab)

    def prow(i, w):
        return pk[i:i + 1, :w]                  # (1, w) row, broadcasts over tokens

    def layer_norm(h, w_row, b_row):
        mu = jnp.mean(h, axis=-1, keepdims=True)
        var = jnp.mean((h - mu) ** 2, axis=-1, keepdims=True)
        return (h - mu) * jax.lax.rsqrt(var + 1e-5) * w_row + b_row

    if causal:
        ri = jax.lax.broadcasted_iota(jnp.int32, (1, s_tgt, s_tgt), 1)
        ci = jax.lax.broadcasted_iota(jnp.int32, (1, s_tgt, s_tgt), 2)
        self_mask = ci <= ri
    else:
        self_mask = None

    def mha(q, k, v, n_q, n_kv, wo16, bo_row, mask):
        # Heads batched over the (folded) batch dim with 3-D einsums; the
        # output projection is distributed per head, so no lane-dim concat.
        acc = jnp.zeros((bh * n_q, D), jnp.float32)
        for h in range(n_heads):
            sl = slice(h * dh, (h + 1) * dh)
            qh = q[:, sl].reshape(bh, n_q, dh).astype(jnp.bfloat16)
            kh = k[:, sl].reshape(bh, n_kv, dh).astype(jnp.bfloat16)
            vh = v[:, sl].reshape(bh, n_kv, dh).astype(jnp.bfloat16)
            s = jnp.einsum('bqd,bkd->bqk', qh, kh,
                           preferred_element_type=jnp.float32) * scale
            if mask is not None:
                s = jnp.where(mask, s, -1e30)
            s = s - jnp.max(s, axis=-1, keepdims=True)
            p = jnp.exp(s)                                        # f32 softmax
            p = p * pl.reciprocal(jnp.sum(p, axis=-1, keepdims=True), approx=True)
            oh = jnp.einsum('bqk,bkd->bqd', p.astype(jnp.bfloat16), vh,
                            preferred_element_type=jnp.float32)
            oh = oh.reshape(bh * n_q, dh).astype(jnp.bfloat16)
            acc = acc + jnp.dot(oh, wo16[sl, :],
                                preferred_element_type=jnp.float32)
        return acc + bo_row

    # ---- self attention + add & norm (post-norm) ----
    x16 = x.astype(jnp.bfloat16)
    q_s = jnp.dot(x16, wq_s_ref[0], preferred_element_type=jnp.float32) + prow(_BQ_S, D)
    k_s = jnp.dot(x16, wk_s_ref[0], preferred_element_type=jnp.float32) + prow(_BK_S, D)
    v_s = jnp.dot(x16, wv_s_ref[0], preferred_element_type=jnp.float32) + prow(_BV_S, D)
    sa = mha(q_s, k_s, v_s, s_tgt, s_tgt, wo_s_ref[0], prow(_BO_S, D), self_mask)
    h1 = layer_norm(x + sa, prow(_LN1_W, D), prow(_LN1_B, D))

    # ---- cross attention over encoder memory + add & norm ----
    mem16 = mem_ref[...].astype(jnp.bfloat16)
    h1_16 = h1.astype(jnp.bfloat16)
    q_c = jnp.dot(h1_16, wq_c_ref[0], preferred_element_type=jnp.float32) + prow(_BQ_C, D)
    k_c = jnp.dot(mem16, wk_c_ref[0], preferred_element_type=jnp.float32) + prow(_BK_C, D)
    v_c = jnp.dot(mem16, wv_c_ref[0], preferred_element_type=jnp.float32) + prow(_BV_C, D)
    ca = mha(q_c, k_c, v_c, s_tgt, s_mem, wo_c_ref[0], prow(_BO_C, D), None)
    h2 = layer_norm(h1 + ca, prow(_LN2_W, D), prow(_LN2_B, D))

    # ---- feed forward (ReLU) + add & norm ----
    f = jnp.dot(h2.astype(jnp.bfloat16), w1_ref[0],
                preferred_element_type=jnp.float32) + prow(_B1, hidden)
    f = jnp.maximum(f, 0.0)
    f = jnp.dot(f.astype(jnp.bfloat16), w2_ref[0],
                preferred_element_type=jnp.float32) + prow(_B2, D)
    y = layer_norm(h2 + f, prow(_LN3_W, D), prow(_LN3_B, D))

    o_ref[...] = y


# ----------------------------------------------------------------------------
# Wrapper: one pallas_call for the whole decoder stack
# ----------------------------------------------------------------------------
def transformer_decoder_stack(x0, memory, params, n_heads, *, batch, s_tgt, s_mem,
                              causal=False):
    D = x0.shape[-1]
    n_layers = params["wq_s"].shape[0]

    # Split batch across an outer "parallel" axis so v7x megacore uses both TCs;
    # this is just a (cheap) serial loop on v5e/v6e.
    nsplit = 2 if (batch % 2 == 0 and batch >= 2) else 1
    bh = batch // nsplit

    kernel = functools.partial(decoder_stack_kernel, n_heads=n_heads,
                               causal=causal, bh=bh, s_tgt=s_tgt, s_mem=s_mem)

    act_spec = pl.BlockSpec((bh * s_tgt, D), lambda i, l: (i, 0))
    mem_spec = pl.BlockSpec((bh * s_mem, D), lambda i, l: (i, 0))

    def wspec(arr):
        return pl.BlockSpec((1,) + arr.shape[1:], lambda i, l: (l, 0, 0))

    weight_names = ["wq_s", "wk_s", "wv_s", "wo_s",
                    "wq_c", "wk_c", "wv_c", "wo_c", "w1", "w2", "packed"]
    in_specs = [act_spec, mem_spec] + [wspec(params[n]) for n in weight_names]

    return pl.pallas_call(
        kernel,
        out_shape=jax.ShapeDtypeStruct((batch * s_tgt, D), jnp.float32),
        grid=(nsplit, n_layers),
        in_specs=in_specs,
        out_specs=act_spec,
        compiler_params=pltpu.CompilerParams(
            dimension_semantics=("parallel", "arbitrary")),
    )(x0, memory, *[params[n] for n in weight_names])


def transformer_decoder_forward(tgt_indices_sb, memory_sbd, params, n_heads,
                                causal=False):
    # tgt_indices_sb: int32 [S, B]; memory_sbd: f32 [S_mem, B, D] (torch layout)
    S, B = tgt_indices_sb.shape
    S_mem = memory_sbd.shape[0]
    D = params["emb"].shape[1]

    # Embedding gather + learned positional add: tiny elementwise glue, left to
    # XLA (fuses with the transpose) instead of a standalone pallas_call.
    emb = jnp.take(params["emb"], tgt_indices_sb, axis=0)          # [S, B, D]
    x0 = emb + params["pos"][:S][:, None, :]                       # [S, B, D]
    x0 = jnp.transpose(x0, (1, 0, 2)).reshape(B * S, D)            # [B*S, D]
    mem = jnp.transpose(memory_sbd, (1, 0, 2)).reshape(B * S_mem, D)

    y = transformer_decoder_stack(x0, mem, params, n_heads,
                                  batch=B, s_tgt=S, s_mem=S_mem, causal=causal)
    return y.reshape(B, S, D).transpose(1, 0, 2)                   # [S, B, D]


# ----------------------------------------------------------------------------
# Parameter construction (deterministic, synthetic)
# ----------------------------------------------------------------------------
def make_params(key, vocab_size, d_model, n_layers, hidden_dim, pad_idx, max_pos):
    assert d_model % 8 == 0 and d_model <= PACK_W and hidden_dim <= PACK_W
    k_emb, k_pos, k_w = jax.random.split(key, 3)

    emb_table = 0.02 * jax.random.normal(k_emb, (vocab_size, d_model), jnp.float32)
    emb_table = emb_table.at[pad_idx].set(0.0)        # padding_idx row is zero
    pos_table = 0.02 * jax.random.normal(k_pos, (max_pos, d_model), jnp.float32)

    wkeys = jax.random.split(k_w, 10)
    s = 0.02

    def W(k, *shape):
        w = s * jax.random.normal(k, (n_layers,) + shape, jnp.float32)
        return w.astype(jnp.bfloat16)                 # bf16 weights: MXU-native, half DMA

    params = {
        "emb": emb_table, "pos": pos_table,
        "wq_s": W(wkeys[0], d_model, d_model),
        "wk_s": W(wkeys[1], d_model, d_model),
        "wv_s": W(wkeys[2], d_model, d_model),
        "wo_s": W(wkeys[3], d_model, d_model),
        "wq_c": W(wkeys[4], d_model, d_model),
        "wk_c": W(wkeys[5], d_model, d_model),
        "wv_c": W(wkeys[6], d_model, d_model),
        "wo_c": W(wkeys[7], d_model, d_model),
        "w1":   W(wkeys[8], d_model, hidden_dim),
        "w2":   W(wkeys[9], hidden_dim, d_model),
    }

    # Pack all (1, D)/(1, hidden) biases + LayerNorm params into one slab.
    packed = jnp.zeros((n_layers, _N_PACK_ROWS, PACK_W), jnp.float32)
    packed = packed.at[:, _LN1_W, :d_model].set(1.0)
    packed = packed.at[:, _LN2_W, :d_model].set(1.0)
    packed = packed.at[:, _LN3_W, :d_model].set(1.0)
    # attention / FFN / LN biases are zero (rows already zero)
    params["packed"] = packed
    return params


if __name__ == "__main__":
    # module hyperparameters (small)
    vocab_size = 50
    embedding_dim = 32
    n_layers = 2
    hidden_dim = 64
    n_heads = 4
    dropout_rate = 0.1     # eval mode: dropout is identity
    pad_idx = 0

    seq_len, batch = 8, 2
    mem_len = 8            # encoder memory length

    key = jax.random.PRNGKey(0)
    k_idx, k_mem, k_par = jax.random.split(key, 3)
    tgt = jax.random.randint(k_idx, (seq_len, batch), 0, vocab_size, dtype=jnp.int32)
    memory = 0.1 * jax.random.normal(k_mem, (mem_len, batch, embedding_dim),
                                     jnp.float32)

    params = make_params(k_par, vocab_size, embedding_dim, n_layers, hidden_dim,
                         pad_idx, max_pos=128)

    # source_mask / attention_mask default to None in the reference forward.
    out = transformer_decoder_forward(tgt, memory, params, n_heads, causal=False)
    out = jax.block_until_ready(out)
    assert out.shape == (seq_len, batch, embedding_dim)
    assert bool(jnp.all(jnp.isfinite(out)))
    print("KERNEL_OK")
</pallas_src>

<mosaic_0001>
module attributes {stable_mosaic.version = 11 : i64} {
  func.func @decoder_stack_kernel(%arg0: i32, %arg1: i32, %arg2: memref<8x32xf32, #tpu.memory_space<vmem>>, %arg3: memref<8x32xf32, #tpu.memory_space<vmem>>, %arg4: memref<1x32x32xbf16, #tpu.memory_space<vmem>>, %arg5: memref<1x32x32xbf16, #tpu.memory_space<vmem>>, %arg6: memref<1x32x32xbf16, #tpu.memory_space<vmem>>, %arg7: memref<1x32x32xbf16, #tpu.memory_space<vmem>>, %arg8: memref<1x32x32xbf16, #tpu.memory_space<vmem>>, %arg9: memref<1x32x32xbf16, #tpu.memory_space<vmem>>, %arg10: memref<1x32x32xbf16, #tpu.memory_space<vmem>>, %arg11: memref<1x32x32xbf16, #tpu.memory_space<vmem>>, %arg12: memref<1x32x64xbf16, #tpu.memory_space<vmem>>, %arg13: memref<1x64x32xbf16, #tpu.memory_space<vmem>>, %arg14: memref<1x16x128xf32, #tpu.memory_space<vmem>>, %arg15: memref<8x32xf32, #tpu.memory_space<vmem>>) attributes {dimension_semantics = [#tpu.dimension_semantics<parallel>, #tpu.dimension_semantics<arbitrary>], iteration_bounds = array<i64: 2, 2>, scalar_prefetch = 0 : i64, scratch_operands = 0 : i64, tpu.core_type = #tpu.core_type<tc>, window_params = [{transform_indices = @transform_0, window_bounds = array<i64: 8, 32>}, {transform_indices = @transform_1, window_bounds = array<i64: 8, 32>}, {transform_indices = @transform_2, window_bounds = array<i64: 1, 32, 32>}, {transform_indices = @transform_3, window_bounds = array<i64: 1, 32, 32>}, {transform_indices = @transform_4, window_bounds = array<i64: 1, 32, 32>}, {transform_indices = @transform_5, window_bounds = array<i64: 1, 32, 32>}, {transform_indices = @transform_6, window_bounds = array<i64: 1, 32, 32>}, {transform_indices = @transform_7, window_bounds = array<i64: 1, 32, 32>}, {transform_indices = @transform_8, window_bounds = array<i64: 1, 32, 32>}, {transform_indices = @transform_9, window_bounds = array<i64: 1, 32, 32>}, {transform_indices = @transform_10, window_bounds = array<i64: 1, 32, 64>}, {transform_indices = @transform_11, window_bounds = array<i64: 1, 64, 32>}, {transform_indices = @transform_12, window_bounds = array<i64: 1, 16, 128>}, {transform_indices = @transform_13, window_bounds = array<i64: 8, 32>}]} {
    %c0_i32 = arith.constant 0 : i32
    %0 = arith.cmpi eq, %arg1, %c0_i32 : i32
    %1 = arith.extui %0 : i1 to i32
    %c0_i32_0 = arith.constant 0 : i32
    %2 = arith.cmpi ne, %1, %c0_i32_0 : i32
    scf.if %2 {
      %c0_112 = arith.constant 0 : index
      %c0_113 = arith.constant 0 : index
      %382 = vector.load %arg2[%c0_112, %c0_113] : memref<8x32xf32, #tpu.memory_space<vmem>>, vector<8x32xf32>
      %c0_114 = arith.constant 0 : index
      %c0_115 = arith.constant 0 : index
      %383 = vector.load %arg15[%c0_114, %c0_115] : memref<8x32xf32, #tpu.memory_space<vmem>>, vector<8x32xf32>
      tpu.vector_store %arg15[%c0_114, %c0_115], %382 {strides = array<i32>} : memref<8x32xf32, #tpu.memory_space<vmem>>, vector<8x32xf32>,
    } else {
    }
    %c0 = arith.constant 0 : index
    %c0_1 = arith.constant 0 : index
    %3 = vector.load %arg15[%c0, %c0_1] : memref<8x32xf32, #tpu.memory_space<vmem>>, vector<8x32xf32>
    %c0_2 = arith.constant 0 : index
    %c0_3 = arith.constant 0 : index
    %c0_4 = arith.constant 0 : index
    %4 = vector.load %arg14[%c0_2, %c0_3, %c0_4] : memref<1x16x128xf32, #tpu.memory_space<vmem>>, vector<1x16x128xf32>
    %5 = vector.shape_cast %4 : vector<1x16x128xf32> to vector<16x128xf32>
    %6 = arith.truncf %3 : vector<8x32xf32> to vector<8x32xbf16>
    %c0_5 = arith.constant 0 : index
    %c0_6 = arith.constant 0 : index
    %c0_7 = arith.constant 0 : index
    %7 = vector.load %arg4[%c0_5, %c0_6, %c0_7] : memref<1x32x32xbf16, #tpu.memory_space<vmem>>, vector<1x32x32xbf16>
    %8 = vector.shape_cast %7 : vector<1x32x32xbf16> to vector<32x32xbf16>
    %cst = arith.constant dense<0.000000e+00> : vector<8x32xf32>
    %9 = tpu.matmul %6, %8, %cst {dimension_numbers = #tpu.dot_dimension_numbers<[1], [0], [0], [1], [0, 0, 1, 1], [], []>} : vector<8x32xbf16>, vector<32x32xbf16>, vector<8x32xf32> -> vector<8x32xf32>
    %10 = vector.extract_strided_slice %5 {offsets = [0, 0], sizes = [1, 32], strides = [1, 1]} : vector<16x128xf32> to vector<1x32xf32>
    %11 = vector.broadcast %10 : vector<1x32xf32> to vector<8x32xf32>
    %12 = arith.addf %9, %11 : vector<8x32xf32>
    %c0_8 = arith.constant 0 : index
    %c0_9 = arith.constant 0 : index
    %c0_10 = arith.constant 0 : index
    %13 = vector.load %arg5[%c0_8, %c0_9, %c0_10] : memref<1x32x32xbf16, #tpu.memory_space<vmem>>, vector<1x32x32xbf16>
    %14 = vector.shape_cast %13 : vector<1x32x32xbf16> to vector<32x32xbf16>
    %cst_11 = arith.constant dense<0.000000e+00> : vector<8x32xf32>
    %15 = tpu.matmul %6, %14, %cst_11 {dimension_numbers = #tpu.dot_dimension_numbers<[1], [0], [0], [1], [0, 0, 1, 1], [], []>} : vector<8x32xbf16>, vector<32x32xbf16>, vector<8x32xf32> -> vector<8x32xf32>
    %16 = vector.extract_strided_slice %5 {offsets = [1, 0], sizes = [1, 32], strides = [1, 1]} : vector<16x128xf32> to vector<1x32xf32>
    %17 = vector.broadcast %16 : vector<1x32xf32> to vector<8x32xf32>
    %18 = arith.addf %15, %17 : vector<8x32xf32>
    %c0_12 = arith.constant 0 : index
    %c0_13 = arith.constant 0 : index
    %c0_14 = arith.constant 0 : index
    %19 = vector.load %arg6[%c0_12, %c0_13, %c0_14] : memref<1x32x32xbf16, #tpu.memory_space<vmem>>, vector<1x32x32xbf16>
    %20 = vector.shape_cast %19 : vector<1x32x32xbf16> to vector<32x32xbf16>
    %cst_15 = arith.constant dense<0.000000e+00> : vector<8x32xf32>
    %21 = tpu.matmul %6, %20, %cst_15 {dimension_numbers = #tpu.dot_dimension_numbers<[1], [0], [0], [1], [0, 0, 1, 1], [], []>} : vector<8x32xbf16>, vector<32x32xbf16>, vector<8x32xf32> -> vector<8x32xf32>
    %22 = vector.extract_strided_slice %5 {offsets = [2, 0], sizes = [1, 32], strides = [1, 1]} : vector<16x128xf32> to vector<1x32xf32>
    %23 = vector.broadcast %22 : vector<1x32xf32> to vector<8x32xf32>
    %24 = arith.addf %21, %23 : vector<8x32xf32>
    %c0_16 = arith.constant 0 : index
    %c0_17 = arith.constant 0 : index
    %c0_18 = arith.constant 0 : index
    %25 = vector.load %arg7[%c0_16, %c0_17, %c0_18] : memref<1x32x32xbf16, #tpu.memory_space<vmem>>, vector<1x32x32xbf16>
    %26 = vector.shape_cast %25 : vector<1x32x32xbf16> to vector<32x32xbf16>
    %27 = vector.extract_strided_slice %5 {offsets = [3, 0], sizes = [1, 32], strides = [1, 1]} : vector<16x128xf32> to vector<1x32xf32>
    %cst_19 = arith.constant 0.000000e+00 : f32
    %28 = vector.broadcast %cst_19 : f32 to vector<8x32xf32>
    %29 = vector.extract_strided_slice %12 {offsets = [0, 0], sizes = [8, 8], strides = [1, 1]} : vector<8x32xf32> to vector<8x8xf32>
    %30 = vector.shape_cast %29 : vector<8x8xf32> to vector<1x8x8xf32>
    %31 = arith.truncf %30 : vector<1x8x8xf32> to vector<1x8x8xbf16>
    %32 = vector.extract_strided_slice %18 {offsets = [0, 0], sizes = [8, 8], strides = [1, 1]} : vector<8x32xf32> to vector<8x8xf32>
    %33 = vector.shape_cast %32 : vector<8x8xf32> to vector<1x8x8xf32>
    %34 = arith.truncf %33 : vector<1x8x8xf32> to vector<1x8x8xbf16>
    %35 = vector.extract_strided_slice %24 {offsets = [0, 0], sizes = [8, 8], strides = [1, 1]} : vector<8x32xf32> to vector<8x8xf32>
    %36 = vector.shape_cast %35 : vector<8x8xf32> to vector<1x8x8xf32>
    %37 = arith.truncf %36 : vector<1x8x8xf32> to vector<1x8x8xbf16>
    "tpu.trace_start"() <{level = 10 : i32, message = "bqd,bkd->bqk"}> : () -> ()
    %cst_20 = arith.constant dense<0.000000e+00> : vector<1x8x8xf32>
    %38 = tpu.matmul %31, %34, %cst_20 {dimension_numbers = #tpu.dot_dimension_numbers<[2], [2], [1], [1], [0, 0, 0, 1, 1, 1], [0], [0]>} : vector<1x8x8xbf16>, vector<1x8x8xbf16>, vector<1x8x8xf32> -> vector<1x8x8xf32>
    "tpu.trace_stop"() : () -> ()
    %cst_21 = arith.constant 0.353553385 : f32
    %39 = vector.broadcast %cst_21 : f32 to vector<1x8x8xf32>
    %40 = arith.mulf %38, %39 : vector<1x8x8xf32>
    %cst_22 = arith.constant dense<0xFF800000> : vector<1x8xf32>
    %41 = vector.multi_reduction <maximumf>, %40, %cst_22 [2] : vector<1x8x8xf32> to vector<1x8xf32>
    %42 = vector.shape_cast %41 : vector<1x8xf32> to vector<1x8x1xf32>
    %43 = vector.broadcast %42 : vector<1x8x1xf32> to vector<1x8x8xf32>
    %44 = arith.subf %40, %43 : vector<1x8x8xf32>
    %45 = math.exp %44 : vector<1x8x8xf32>
    %cst_23 = arith.constant dense<0.000000e+00> : vector<1x8xf32>
    %46 = vector.multi_reduction <add>, %45, %cst_23 [2] : vector<1x8x8xf32> to vector<1x8xf32>
    %47 = vector.shape_cast %46 : vector<1x8xf32> to vector<1x8x1xf32>
    %48 = tpu.reciprocal %47 {approx = true} : vector<1x8x1xf32> -> vector<1x8x1xf32>
    %49 = vector.broadcast %48 : vector<1x8x1xf32> to vector<1x8x8xf32>
    %50 = arith.mulf %45, %49 : vector<1x8x8xf32>
    %51 = arith.truncf %50 : vector<1x8x8xf32> to vector<1x8x8xbf16>
    "tpu.trace_start"() <{level = 10 : i32, message = "bqk,bkd->bqd"}> : () -> ()
    %cst_24 = arith.constant dense<0.000000e+00> : vector<1x8x8xf32>
    %52 = tpu.matmul %51, %37, %cst_24 {dimension_numbers = #tpu.dot_dimension_numbers<[2], [1], [1], [2], [0, 0, 0, 1, 1, 2], [0], [0]>} : vector<1x8x8xbf16>, vector<1x8x8xbf16>, vector<1x8x8xf32> -> vector<1x8x8xf32>
    "tpu.trace_stop"() : () -> ()
    %53 = vector.shape_cast %52 : vector<1x8x8xf32> to vector<8x8xf32>
    %54 = arith.truncf %53 : vector<8x8xf32> to vector<8x8xbf16>
    %55 = vector.extract_strided_slice %26 {offsets = [0, 0], sizes = [8, 32], strides = [1, 1]} : vector<32x32xbf16> to vector<8x32xbf16>
    %cst_25 = arith.constant dense<0.000000e+00> : vector<8x32xf32>
    %56 = tpu.matmul %54, %55, %cst_25 {dimension_numbers = #tpu.dot_dimension_numbers<[1], [0], [0], [1], [0, 0, 1, 1], [], []>} : vector<8x8xbf16>, vector<8x32xbf16>, vector<8x32xf32> -> vector<8x32xf32>
    %57 = arith.addf %28, %56 : vector<8x32xf32>
    %58 = vector.extract_strided_slice %12 {offsets = [0, 8], sizes = [8, 8], strides = [1, 1]} : vector<8x32xf32> to vector<8x8xf32>
    %59 = vector.shape_cast %58 : vector<8x8xf32> to vector<1x8x8xf32>
    %60 = arith.truncf %59 : vector<1x8x8xf32> to vector<1x8x8xbf16>
    %61 = vector.extract_strided_slice %18 {offsets = [0, 8], sizes = [8, 8], strides = [1, 1]} : vector<8x32xf32> to vector<8x8xf32>
    %62 = vector.shape_cast %61 : vector<8x8xf32> to vector<1x8x8xf32>
    %63 = arith.truncf %62 : vector<1x8x8xf32> to vector<1x8x8xbf16>
    %64 = vector.extract_strided_slice %24 {offsets = [0, 8], sizes = [8, 8], strides = [1, 1]} : vector<8x32xf32> to vector<8x8xf32>
    %65 = vector.shape_cast %64 : vector<8x8xf32> to vector<1x8x8xf32>
    %66 = arith.truncf %65 : vector<1x8x8xf32> to vector<1x8x8xbf16>
    "tpu.trace_start"() <{level = 10 : i32, message = "bqd,bkd->bqk"}> : () -> ()
    %cst_26 = arith.constant dense<0.000000e+00> : vector<1x8x8xf32>
    %67 = tpu.matmul %60, %63, %cst_26 {dimension_numbers = #tpu.dot_dimension_numbers<[2], [2], [1], [1], [0, 0, 0, 1, 1, 1], [0], [0]>} : vector<1x8x8xbf16>, vector<1x8x8xbf16>, vector<1x8x8xf32> -> vector<1x8x8xf32>
    "tpu.trace_stop"() : () -> ()
    %cst_27 = arith.constant 0.353553385 : f32
    %68 = vector.broadcast %cst_27 : f32 to vector<1x8x8xf32>
    %69 = arith.mulf %67, %68 : vector<1x8x8xf32>
    %cst_28 = arith.constant dense<0xFF800000> : vector<1x8xf32>
    %70 = vector.multi_reduction <maximumf>, %69, %cst_28 [2] : vector<1x8x8xf32> to vector<1x8xf32>
    %71 = vector.shape_cast %70 : vector<1x8xf32> to vector<1x8x1xf32>
    %72 = vector.broadcast %71 : vector<1x8x1xf32> to vector<1x8x8xf32>
    %73 = arith.subf %69, %72 : vector<1x8x8xf32>
    %74 = math.exp %73 : vector<1x8x8xf32>
    %cst_29 = arith.constant dense<0.000000e+00> : vector<1x8xf32>
    %75 = vector.multi_reduction <add>, %74, %cst_29 [2] : vector<1x8x8xf32> to vector<1x8xf32>
    %76 = vector.shape_cast %75 : vector<1x8xf32> to vector<1x8x1xf32>
    %77 = tpu.reciprocal %76 {approx = true} : vector<1x8x1xf32> -> vector<1x8x1xf32>
    %78 = vector.broadcast %77 : vector<1x8x1xf32> to vector<1x8x8xf32>
    %79 = arith.mulf %74, %78 : vector<1x8x8xf32>
    %80 = arith.truncf %79 : vector<1x8x8xf32> to vector<1x8x8xbf16>
    "tpu.trace_start"() <{level = 10 : i32, message = "bqk,bkd->bqd"}> : () -> ()
    %cst_30 = arith.constant dense<0.000000e+00> : vector<1x8x8xf32>
    %81 = tpu.matmul %80, %66, %cst_30 {dimension_numbers = #tpu.dot_dimension_numbers<[2], [1], [1], [2], [0, 0, 0, 1, 1, 2], [0], [0]>} : vector<1x8x8xbf16>, vector<1x8x8xbf16>, vector<1x8x8xf32> -> vector<1x8x8xf32>
    "tpu.trace_stop"() : () -> ()
    %82 = vector.shape_cast %81 : vector<1x8x8xf32> to vector<8x8xf32>
    %83 = arith.truncf %82 : vector<8x8xf32> to vector<8x8xbf16>
    %84 = vector.extract_strided_slice %26 {offsets = [8, 0], sizes = [8, 32], strides = [1, 1]} : vector<32x32xbf16> to vector<8x32xbf16>
    %cst_31 = arith.constant dense<0.000000e+00> : vector<8x32xf32>
    %85 = tpu.matmul %83, %84, %cst_31 {dimension_numbers = #tpu.dot_dimension_numbers<[1], [0], [0], [1], [0, 0, 1, 1], [], []>} : vector<8x8xbf16>, vector<8x32xbf16>, vector<8x32xf32> -> vector<8x32xf32>
    %86 = arith.addf %57, %85 : vector<8x32xf32>
    %87 = vector.extract_strided_slice %12 {offsets = [0, 16], sizes = [8, 8], strides = [1, 1]} : vector<8x32xf32> to vector<8x8xf32>
    %88 = vector.shape_cast %87 : vector<8x8xf32> to vector<1x8x8xf32>
    %89 = arith.truncf %88 : vector<1x8x8xf32> to vector<1x8x8xbf16>
    %90 = vector.extract_strided_slice %18 {offsets = [0, 16], sizes = [8, 8], strides = [1, 1]} : vector<8x32xf32> to vector<8x8xf32>
    %91 = vector.shape_cast %90 : vector<8x8xf32> to vector<1x8x8xf32>
    %92 = arith.truncf %91 : vector<1x8x8xf32> to vector<1x8x8xbf16>
    %93 = vector.extract_strided_slice %24 {offsets = [0, 16], sizes = [8, 8], strides = [1, 1]} : vector<8x32xf32> to vector<8x8xf32>
    %94 = vector.shape_cast %93 : vector<8x8xf32> to vector<1x8x8xf32>
    %95 = arith.truncf %94 : vector<1x8x8xf32> to vector<1x8x8xbf16>
    "tpu.trace_start"() <{level = 10 : i32, message = "bqd,bkd->bqk"}> : () -> ()
    %cst_32 = arith.constant dense<0.000000e+00> : vector<1x8x8xf32>
    %96 = tpu.matmul %89, %92, %cst_32 {dimension_numbers = #tpu.dot_dimension_numbers<[2], [2], [1], [1], [0, 0, 0, 1, 1, 1], [0], [0]>} : vector<1x8x8xbf16>, vector<1x8x8xbf16>, vector<1x8x8xf32> -> vector<1x8x8xf32>
    "tpu.trace_stop"() : () -> ()
    %cst_33 = arith.constant 0.353553385 : f32
    %97 = vector.broadcast %cst_33 : f32 to vector<1x8x8xf32>
    %98 = arith.mulf %96, %97 : vector<1x8x8xf32>
    %cst_34 = arith.constant dense<0xFF800000> : vector<1x8xf32>
    %99 = vector.multi_reduction <maximumf>, %98, %cst_34 [2] : vector<1x8x8xf32> to vector<1x8xf32>
    %100 = vector.shape_cast %99 : vector<1x8xf32> to vector<1x8x1xf32>
    %101 = vector.broadcast %100 : vector<1x8x1xf32> to vector<1x8x8xf32>
    %102 = arith.subf %98, %101 : vector<1x8x8xf32>
    %103 = math.exp %102 : vector<1x8x8xf32>
    %cst_35 = arith.constant dense<0.000000e+00> : vector<1x8xf32>
    %104 = vector.multi_reduction <add>, %103, %cst_35 [2] : vector<1x8x8xf32> to vector<1x8xf32>
    %105 = vector.shape_cast %104 : vector<1x8xf32> to vector<1x8x1xf32>
    %106 = tpu.reciprocal %105 {approx = true} : vector<1x8x1xf32> -> vector<1x8x1xf32>
    %107 = vector.broadcast %106 : vector<1x8x1xf32> to vector<1x8x8xf32>
    %108 = arith.mulf %103, %107 : vector<1x8x8xf32>
    %109 = arith.truncf %108 : vector<1x8x8xf32> to vector<1x8x8xbf16>
    "tpu.trace_start"() <{level = 10 : i32, message = "bqk,bkd->bqd"}> : () -> ()
    %cst_36 = arith.constant dense<0.000000e+00> : vector<1x8x8xf32>
    %110 = tpu.matmul %109, %95, %cst_36 {dimension_numbers = #tpu.dot_dimension_numbers<[2], [1], [1], [2], [0, 0, 0, 1, 1, 2], [0], [0]>} : vector<1x8x8xbf16>, vector<1x8x8xbf16>, vector<1x8x8xf32> -> vector<1x8x8xf32>
    "tpu.trace_stop"() : () -> ()
    %111 = vector.shape_cast %110 : vector<1x8x8xf32> to vector<8x8xf32>
    %112 = arith.truncf %111 : vector<8x8xf32> to vector<8x8xbf16>
    %113 = vector.extract_strided_slice %26 {offsets = [16, 0], sizes = [8, 32], strides = [1, 1]} : vector<32x32xbf16> to vector<8x32xbf16>
    %cst_37 = arith.constant dense<0.000000e+00> : vector<8x32xf32>
    %114 = tpu.matmul %112, %113, %cst_37 {dimension_numbers = #tpu.dot_dimension_numbers<[1], [0], [0], [1], [0, 0, 1, 1], [], []>} : vector<8x8xbf16>, vector<8x32xbf16>, vector<8x32xf32> -> vector<8x32xf32>
    %115 = arith.addf %86, %114 : vector<8x32xf32>
    %116 = vector.extract_strided_slice %12 {offsets = [0, 24], sizes = [8, 8], strides = [1, 1]} : vector<8x32xf32> to vector<8x8xf32>
    %117 = vector.shape_cast %116 : vector<8x8xf32> to vector<1x8x8xf32>
    %118 = arith.truncf %117 : vector<1x8x8xf32> to vector<1x8x8xbf16>
    %119 = vector.extract_strided_slice %18 {offsets = [0, 24], sizes = [8, 8], strides = [1, 1]} : vector<8x32xf32> to vector<8x8xf32>
    %120 = vector.shape_cast %119 : vector<8x8xf32> to vector<1x8x8xf32>
    %121 = arith.truncf %120 : vector<1x8x8xf32> to vector<1x8x8xbf16>
    %122 = vector.extract_strided_slice %24 {offsets = [0, 24], sizes = [8, 8], strides = [1, 1]} : vector<8x32xf32> to vector<8x8xf32>
    %123 = vector.shape_cast %122 : vector<8x8xf32> to vector<1x8x8xf32>
    %124 = arith.truncf %123 : vector<1x8x8xf32> to vector<1x8x8xbf16>
    "tpu.trace_start"() <{level = 10 : i32, message = "bqd,bkd->bqk"}> : () -> ()
    %cst_38 = arith.constant dense<0.000000e+00> : vector<1x8x8xf32>
    %125 = tpu.matmul %118, %121, %cst_38 {dimension_numbers = #tpu.dot_dimension_numbers<[2], [2], [1], [1], [0, 0, 0, 1, 1, 1], [0], [0]>} : vector<1x8x8xbf16>, vector<1x8x8xbf16>, vector<1x8x8xf32> -> vector<1x8x8xf32>
    "tpu.trace_stop"() : () -> ()
    %cst_39 = arith.constant 0.353553385 : f32
    %126 = vector.broadcast %cst_39 : f32 to vector<1x8x8xf32>
    %127 = arith.mulf %125, %126 : vector<1x8x8xf32>
    %cst_40 = arith.constant dense<0xFF800000> : vector<1x8xf32>
    %128 = vector.multi_reduction <maximumf>, %127, %cst_40 [2] : vector<1x8x8xf32> to vector<1x8xf32>
    %129 = vector.shape_cast %128 : vector<1x8xf32> to vector<1x8x1xf32>
    %130 = vector.broadcast %129 : vector<1x8x1xf32> to vector<1x8x8xf32>
    %131 = arith.subf %127, %130 : vector<1x8x8xf32>
    %132 = math.exp %131 : vector<1x8x8xf32>
    %cst_41 = arith.constant dense<0.000000e+00> : vector<1x8xf32>
    %133 = vector.multi_reduction <add>, %132, %cst_41 [2] : vector<1x8x8xf32> to vector<1x8xf32>
    %134 = vector.shape_cast %133 : vector<1x8xf32> to vector<1x8x1xf32>
    %135 = tpu.reciprocal %134 {approx = true} : vector<1x8x1xf32> -> vector<1x8x1xf32>
    %136 = vector.broadcast %135 : vector<1x8x1xf32> to vector<1x8x8xf32>
    %137 = arith.mulf %132, %136 : vector<1x8x8xf32>
    %138 = arith.truncf %137 : vector<1x8x8xf32> to vector<1x8x8xbf16>
    "tpu.trace_start"() <{level = 10 : i32, message = "bqk,bkd->bqd"}> : () -> ()
    %cst_42 = arith.constant dense<0.000000e+00> : vector<1x8x8xf32>
    %139 = tpu.matmul %138, %124, %cst_42 {dimension_numbers = #tpu.dot_dimension_numbers<[2], [1], [1], [2], [0, 0, 0, 1, 1, 2], [0], [0]>} : vector<1x8x8xbf16>, vector<1x8x8xbf16>, vector<1x8x8xf32> -> vector<1x8x8xf32>
    "tpu.trace_stop"() : () -> ()
    %140 = vector.shape_cast %139 : vector<1x8x8xf32> to vector<8x8xf32>
    %141 = arith.truncf %140 : vector<8x8xf32> to vector<8x8xbf16>
    %142 = vector.extract_strided_slice %26 {offsets = [24, 0], sizes = [8, 32], strides = [1, 1]} : vector<32x32xbf16> to vector<8x32xbf16>
    %cst_43 = arith.constant dense<0.000000e+00> : vector<8x32xf32>
    %143 = tpu.matmul %141, %142, %cst_43 {dimension_numbers = #tpu.dot_dimension_numbers<[1], [0], [0], [1], [0, 0, 1, 1], [], []>} : vector<8x8xbf16>, vector<8x32xbf16>, vector<8x32xf32> -> vector<8x32xf32>
    %144 = arith.addf %115, %143 : vector<8x32xf32>
    %145 = vector.broadcast %27 : vector<1x32xf32> to vector<8x32xf32>
    %146 = arith.addf %144, %145 : vector<8x32xf32>
    %147 = arith.addf %3, %146 : vector<8x32xf32>
    %148 = vector.extract_strided_slice %5 {offsets = [8, 0], sizes = [1, 32], strides = [1, 1]} : vector<16x128xf32> to vector<1x32xf32>
    %149 = vector.extract_strided_slice %5 {offsets = [9, 0], sizes = [1, 32], strides = [1, 1]} : vector<16x128xf32> to vector<1x32xf32>
    %cst_44 = arith.constant dense<0.000000e+00> : vector<8xf32>
    %150 = vector.multi_reduction <add>, %147, %cst_44 [1] : vector<8x32xf32> to vector<8xf32>
    %151 = vector.shape_cast %150 : vector<8xf32> to vector<8x1xf32>
    %cst_45 = arith.constant 3.200000e+01 : f32
    %152 = vector.broadcast %cst_45 : f32 to vector<8x1xf32>
    %153 = arith.divf %151, %152 : vector<8x1xf32>
    %154 = vector.broadcast %153 : vector<8x1xf32> to vector<8x32xf32>
    %155 = arith.subf %147, %154 : vector<8x32xf32>
    %156 = arith.mulf %155, %155 : vector<8x32xf32>
    %cst_46 = arith.constant dense<0.000000e+00> : vector<8xf32>
    %157 = vector.multi_reduction <add>, %156, %cst_46 [1] : vector<8x32xf32> to vector<8xf32>
    %158 = vector.shape_cast %157 : vector<8xf32> to vector<8x1xf32>
    %cst_47 = arith.constant 3.200000e+01 : f32
    %159 = vector.broadcast %cst_47 : f32 to vector<8x1xf32>
    %160 = arith.divf %158, %159 : vector<8x1xf32>
    %161 = vector.broadcast %153 : vector<8x1xf32> to vector<8x32xf32>
    %162 = arith.subf %147, %161 : vector<8x32xf32>
    %cst_48 = arith.constant 9.99999974E-6 : f32
    %163 = vector.broadcast %cst_48 : f32 to vector<8x1xf32>
    %164 = arith.addf %160, %163 : vector<8x1xf32>
    %165 = math.rsqrt %164 : vector<8x1xf32>
    %166 = vector.broadcast %165 : vector<8x1xf32> to vector<8x32xf32>
    %167 = arith.mulf %162, %166 : vector<8x32xf32>
    %168 = vector.broadcast %148 : vector<1x32xf32> to vector<8x32xf32>
    %169 = arith.mulf %167, %168 : vector<8x32xf32>
    %170 = vector.broadcast %149 : vector<1x32xf32> to vector<8x32xf32>
    %171 = arith.addf %169, %170 : vector<8x32xf32>
    %c0_49 = arith.constant 0 : index
    %c0_50 = arith.constant 0 : index
    %172 = vector.load %arg3[%c0_49, %c0_50] : memref<8x32xf32, #tpu.memory_space<vmem>>, vector<8x32xf32>
    %173 = arith.truncf %172 : vector<8x32xf32> to vector<8x32xbf16>
    %174 = arith.truncf %171 : vector<8x32xf32> to vector<8x32xbf16>
    %c0_51 = arith.constant 0 : index
    %c0_52 = arith.constant 0 : index
    %c0_53 = arith.constant 0 : index
    %175 = vector.load %arg8[%c0_51, %c0_52, %c0_53] : memref<1x32x32xbf16, #tpu.memory_space<vmem>>, vector<1x32x32xbf16>
    %176 = vector.shape_cast %175 : vector<1x32x32xbf16> to vector<32x32xbf16>
    %cst_54 = arith.constant dense<0.000000e+00> : vector<8x32xf32>
    %177 = tpu.matmul %174, %176, %cst_54 {dimension_numbers = #tpu.dot_dimension_numbers<[1], [0], [0], [1], [0, 0, 1, 1], [], []>} : vector<8x32xbf16>, vector<32x32xbf16>, vector<8x32xf32> -> vector<8x32xf32>
    %178 = vector.extract_strided_slice %5 {offsets = [4, 0], sizes = [1, 32], strides = [1, 1]} : vector<16x128xf32> to vector<1x32xf32>
    %179 = vector.broadcast %178 : vector<1x32xf32> to vector<8x32xf32>
    %180 = arith.addf %177, %179 : vector<8x32xf32>
    %c0_55 = arith.constant 0 : index
    %c0_56 = arith.constant 0 : index
    %c0_57 = arith.constant 0 : index
    %181 = vector.load %arg9[%c0_55, %c0_56, %c0_57] : memref<1x32x32xbf16, #tpu.memory_space<vmem>>, vector<1x32x32xbf16>
    %182 = vector.shape_cast %181 : vector<1x32x32xbf16> to vector<32x32xbf16>
    %cst_58 = arith.constant dense<0.000000e+00> : vector<8x32xf32>
    %183 = tpu.matmul %173, %182, %cst_58 {dimension_numbers = #tpu.dot_dimension_numbers<[1], [0], [0], [1], [0, 0, 1, 1], [], []>} : vector<8x32xbf16>, vector<32x32xbf16>, vector<8x32xf32> -> vector<8x32xf32>
    %184 = vector.extract_strided_slice %5 {offsets = [5, 0], sizes = [1, 32], strides = [1, 1]} : vector<16x128xf32> to vector<1x32xf32>
    %185 = vector.broadcast %184 : vector<1x32xf32> to vector<8x32xf32>
    %186 = arith.addf %183, %185 : vector<8x32xf32>
    %c0_59 = arith.constant 0 : index
    %c0_60 = arith.constant 0 : index
    %c0_61 = arith.constant 0 : index
    %187 = vector.load %arg10[%c0_59, %c0_60, %c0_61] : memref<1x32x32xbf16, #tpu.memory_space<vmem>>, vector<1x32x32xbf16>
    %188 = vector.shape_cast %187 : vector<1x32x32xbf16> to vector<32x32xbf16>
    %cst_62 = arith.constant dense<0.000000e+00> : vector<8x32xf32>
    %189 = tpu.matmul %173, %188, %cst_62 {dimension_numbers = #tpu.dot_dimension_numbers<[1], [0], [0], [1], [0, 0, 1, 1], [], []>} : vector<8x32xbf16>, vector<32x32xbf16>, vector<8x32xf32> -> vector<8x32xf32>
    %190 = vector.extract_strided_slice %5 {offsets = [6, 0], sizes = [1, 32], strides = [1, 1]} : vector<16x128xf32> to vector<1x32xf32>
    %191 = vector.broadcast %190 : vector<1x32xf32> to vector<8x32xf32>
    %192 = arith.addf %189, %191 : vector<8x32xf32>
    %c0_63 = arith.constant 0 : index
    %c0_64 = arith.constant 0 : index
    %c0_65 = arith.constant 0 : index
    %193 = vector.load %arg11[%c0_63, %c0_64, %c0_65] : memref<1x32x32xbf16, #tpu.memory_space<vmem>>, vector<1x32x32xbf16>
    %194 = vector.shape_cast %193 : vector<1x32x32xbf16> to vector<32x32xbf16>
    %195 = vector.extract_strided_slice %5 {offsets = [7, 0], sizes = [1, 32], strides = [1, 1]} : vector<16x128xf32> to vector<1x32xf32>
    %cst_66 = arith.constant 0.000000e+00 : f32
    %196 = vector.broadcast %cst_66 : f32 to vector<8x32xf32>
    %197 = vector.extract_strided_slice %180 {offsets = [0, 0], sizes = [8, 8], strides = [1, 1]} : vector<8x32xf32> to vector<8x8xf32>
    %198 = vector.shape_cast %197 : vector<8x8xf32> to vector<1x8x8xf32>
    %199 = arith.truncf %198 : vector<1x8x8xf32> to vector<1x8x8xbf16>
    %200 = vector.extract_strided_slice %186 {offsets = [0, 0], sizes = [8, 8], strides = [1, 1]} : vector<8x32xf32> to vector<8x8xf32>
    %201 = vector.shape_cast %200 : vector<8x8xf32> to vector<1x8x8xf32>
    %202 = arith.truncf %201 : vector<1x8x8xf32> to vector<1x8x8xbf16>
    %203 = vector.extract_strided_slice %192 {offsets = [0, 0], sizes = [8, 8], strides = [1, 1]} : vector<8x32xf32> to vector<8x8xf32>
    %204 = vector.shape_cast %203 : vector<8x8xf32> to vector<1x8x8xf32>
    %205 = arith.truncf %204 : vector<1x8x8xf32> to vector<1x8x8xbf16>
    "tpu.trace_start"() <{level = 10 : i32, message = "bqd,bkd->bqk"}> : () -> ()
    %cst_67 = arith.constant dense<0.000000e+00> : vector<1x8x8xf32>
    %206 = tpu.matmul %199, %202, %cst_67 {dimension_numbers = #tpu.dot_dimension_numbers<[2], [2], [1], [1], [0, 0, 0, 1, 1, 1], [0], [0]>} : vector<1x8x8xbf16>, vector<1x8x8xbf16>, vector<1x8x8xf32> -> vector<1x8x8xf32>
    "tpu.trace_stop"() : () -> ()
    %cst_68 = arith.constant 0.353553385 : f32
    %207 = vector.broadcast %cst_68 : f32 to vector<1x8x8xf32>
    %208 = arith.mulf %206, %207 : vector<1x8x8xf32>
    %cst_69 = arith.constant dense<0xFF800000> : vector<1x8xf32>
    %209 = vector.multi_reduction <maximumf>, %208, %cst_69 [2] : vector<1x8x8xf32> to vector<1x8xf32>
    %210 = vector.shape_cast %209 : vector<1x8xf32> to vector<1x8x1xf32>
    %211 = vector.broadcast %210 : vector<1x8x1xf32> to vector<1x8x8xf32>
    %212 = arith.subf %208, %211 : vector<1x8x8xf32>
    %213 = math.exp %212 : vector<1x8x8xf32>
    %cst_70 = arith.constant dense<0.000000e+00> : vector<1x8xf32>
    %214 = vector.multi_reduction <add>, %213, %cst_70 [2] : vector<1x8x8xf32> to vector<1x8xf32>
    %215 = vector.shape_cast %214 : vector<1x8xf32> to vector<1x8x1xf32>
    %216 = tpu.reciprocal %215 {approx = true} : vector<1x8x1xf32> -> vector<1x8x1xf32>
    %217 = vector.broadcast %216 : vector<1x8x1xf32> to vector<1x8x8xf32>
    %218 = arith.mulf %213, %217 : vector<1x8x8xf32>
    %219 = arith.truncf %218 : vector<1x8x8xf32> to vector<1x8x8xbf16>
    "tpu.trace_start"() <{level = 10 : i32, message = "bqk,bkd->bqd"}> : () -> ()
    %cst_71 = arith.constant dense<0.000000e+00> : vector<1x8x8xf32>
    %220 = tpu.matmul %219, %205, %cst_71 {dimension_numbers = #tpu.dot_dimension_numbers<[2], [1], [1], [2], [0, 0, 0, 1, 1, 2], [0], [0]>} : vector<1x8x8xbf16>, vector<1x8x8xbf16>, vector<1x8x8xf32> -> vector<1x8x8xf32>
    "tpu.trace_stop"() : () -> ()
    %221 = vector.shape_cast %220 : vector<1x8x8xf32> to vector<8x8xf32>
    %222 = arith.truncf %221 : vector<8x8xf32> to vector<8x8xbf16>
    %223 = vector.extract_strided_slice %194 {offsets = [0, 0], sizes = [8, 32], strides = [1, 1]} : vector<32x32xbf16> to vector<8x32xbf16>
    %cst_72 = arith.constant dense<0.000000e+00> : vector<8x32xf32>
    %224 = tpu.matmul %222, %223, %cst_72 {dimension_numbers = #tpu.dot_dimension_numbers<[1], [0], [0], [1], [0, 0, 1, 1], [], []>} : vector<8x8xbf16>, vector<8x32xbf16>, vector<8x32xf32> -> vector<8x32xf32>
    %225 = arith.addf %196, %224 : vector<8x32xf32>
    %226 = vector.extract_strided_slice %180 {offsets = [0, 8], sizes = [8, 8], strides = [1, 1]} : vector<8x32xf32> to vector<8x8xf32>
    %227 = vector.shape_cast %226 : vector<8x8xf32> to vector<1x8x8xf32>
    %228 = arith.truncf %227 : vector<1x8x8xf32> to vector<1x8x8xbf16>
    %229 = vector.extract_strided_slice %186 {offsets = [0, 8], sizes = [8, 8], strides = [1, 1]} : vector<8x32xf32> to vector<8x8xf32>
    %230 = vector.shape_cast %229 : vector<8x8xf32> to vector<1x8x8xf32>
    %231 = arith.truncf %230 : vector<1x8x8xf32> to vector<1x8x8xbf16>
    %232 = vector.extract_strided_slice %192 {offsets = [0, 8], sizes = [8, 8], strides = [1, 1]} : vector<8x32xf32> to vector<8x8xf32>
    %233 = vector.shape_cast %232 : vector<8x8xf32> to vector<1x8x8xf32>
    %234 = arith.truncf %233 : vector<1x8x8xf32> to vector<1x8x8xbf16>
    "tpu.trace_start"() <{level = 10 : i32, message = "bqd,bkd->bqk"}> : () -> ()
    %cst_73 = arith.constant dense<0.000000e+00> : vector<1x8x8xf32>
    %235 = tpu.matmul %228, %231, %cst_73 {dimension_numbers = #tpu.dot_dimension_numbers<[2], [2], [1], [1], [0, 0, 0, 1, 1, 1], [0], [0]>} : vector<1x8x8xbf16>, vector<1x8x8xbf16>, vector<1x8x8xf32> -> vector<1x8x8xf32>
    "tpu.trace_stop"() : () -> ()
    %cst_74 = arith.constant 0.353553385 : f32
    %236 = vector.broadcast %cst_74 : f32 to vector<1x8x8xf32>
    %237 = arith.mulf %235, %236 : vector<1x8x8xf32>
    %cst_75 = arith.constant dense<0xFF800000> : vector<1x8xf32>
    %238 = vector.multi_reduction <maximumf>, %237, %cst_75 [2] : vector<1x8x8xf32> to vector<1x8xf32>
    %239 = vector.shape_cast %238 : vector<1x8xf32> to vector<1x8x1xf32>
    %240 = vector.broadcast %239 : vector<1x8x1xf32> to vector<1x8x8xf32>
    %241 = arith.subf %237, %240 : vector<1x8x8xf32>
    %242 = math.exp %241 : vector<1x8x8xf32>
    %cst_76 = arith.constant dense<0.000000e+00> : vector<1x8xf32>
    %243 = vector.multi_reduction <add>, %242, %cst_76 [2] : vector<1x8x8xf32> to vector<1x8xf32>
    %244 = vector.shape_cast %243 : vector<1x8xf32> to vector<1x8x1xf32>
    %245 = tpu.reciprocal %244 {approx = true} : vector<1x8x1xf32> -> vector<1x8x1xf32>
    %246 = vector.broadcast %245 : vector<1x8x1xf32> to vector<1x8x8xf32>
    %247 = arith.mulf %242, %246 : vector<1x8x8xf32>
    %248 = arith.truncf %247 : vector<1x8x8xf32> to vector<1x8x8xbf16>
    "tpu.trace_start"() <{level = 10 : i32, message = "bqk,bkd->bqd"}> : () -> ()
    %cst_77 = arith.constant dense<0.000000e+00> : vector<1x8x8xf32>
    %249 = tpu.matmul %248, %234, %cst_77 {dimension_numbers = #tpu.dot_dimension_numbers<[2], [1], [1], [2], [0, 0, 0, 1, 1, 2], [0], [0]>} : vector<1x8x8xbf16>, vector<1x8x8xbf16>, vector<1x8x8xf32> -> vector<1x8x8xf32>
    "tpu.trace_stop"() : () -> ()
    %250 = vector.shape_cast %249 : vector<1x8x8xf32> to vector<8x8xf32>
    %251 = arith.truncf %250 : vector<8x8xf32> to vector<8x8xbf16>
    %252 = vector.extract_strided_slice %194 {offsets = [8, 0], sizes = [8, 32], strides = [1, 1]} : vector<32x32xbf16> to vector<8x32xbf16>
    %cst_78 = arith.constant dense<0.000000e+00> : vector<8x32xf32>
    %253 = tpu.matmul %251, %252, %cst_78 {dimension_numbers = #tpu.dot_dimension_numbers<[1], [0], [0], [1], [0, 0, 1, 1], [], []>} : vector<8x8xbf16>, vector<8x32xbf16>, vector<8x32xf32> -> vector<8x32xf32>
    %254 = arith.addf %225, %253 : vector<8x32xf32>
    %255 = vector.extract_strided_slice %180 {offsets = [0, 16], sizes = [8, 8], strides = [1, 1]} : vector<8x32xf32> to vector<8x8xf32>
    %256 = vector.shape_cast %255 : vector<8x8xf32> to vector<1x8x8xf32>
    %257 = arith.truncf %256 : vector<1x8x8xf32> to vector<1x8x8xbf16>
    %258 = vector.extract_strided_slice %186 {offsets = [0, 16], sizes = [8, 8], strides = [1, 1]} : vector<8x32xf32> to vector<8x8xf32>
    %259 = vector.shape_cast %258 : vector<8x8xf32> to vector<1x8x8xf32>
    %260 = arith.truncf %259 : vector<1x8x8xf32> to vector<1x8x8xbf16>
    %261 = vector.extract_strided_slice %192 {offsets = [0, 16], sizes = [8, 8], strides = [1, 1]} : vector<8x32xf32> to vector<8x8xf32>
    %262 = vector.shape_cast %261 : vector<8x8xf32> to vector<1x8x8xf32>
    %263 = arith.truncf %262 : vector<1x8x8xf32> to vector<1x8x8xbf16>
    "tpu.trace_start"() <{level = 10 : i32, message = "bqd,bkd->bqk"}> : () -> ()
    %cst_79 = arith.constant dense<0.000000e+00> : vector<1x8x8xf32>
    %264 = tpu.matmul %257, %260, %cst_79 {dimension_numbers = #tpu.dot_dimension_numbers<[2], [2], [1], [1], [0, 0, 0, 1, 1, 1], [0], [0]>} : vector<1x8x8xbf16>, vector<1x8x8xbf16>, vector<1x8x8xf32> -> vector<1x8x8xf32>
    "tpu.trace_stop"() : () -> ()
    %cst_80 = arith.constant 0.353553385 : f32
    %265 = vector.broadcast %cst_80 : f32 to vector<1x8x8xf32>
    %266 = arith.mulf %264, %265 : vector<1x8x8xf32>
    %cst_81 = arith.constant dense<0xFF800000> : vector<1x8xf32>
    %267 = vector.multi_reduction <maximumf>, %266, %cst_81 [2] : vector<1x8x8xf32> to vector<1x8xf32>
    %268 = vector.shape_cast %267 : vector<1x8xf32> to vector<1x8x1xf32>
    %269 = vector.broadcast %268 : vector<1x8x1xf32> to vector<1x8x8xf32>
    %270 = arith.subf %266, %269 : vector<1x8x8xf32>
    %271 = math.exp %270 : vector<1x8x8xf32>
    %cst_82 = arith.constant dense<0.000000e+00> : vector<1x8xf32>
    %272 = vector.multi_reduction <add>, %271, %cst_82 [2] : vector<1x8x8xf32> to vector<1x8xf32>
    %273 = vector.shape_cast %272 : vector<1x8xf32> to vector<1x8x1xf32>
    %274 = tpu.reciprocal %273 {approx = true} : vector<1x8x1xf32> -> vector<1x8x1xf32>
    %275 = vector.broadcast %274 : vector<1x8x1xf32> to vector<1x8x8xf32>
    %276 = arith.mulf %271, %275 : vector<1x8x8xf32>
    %277 = arith.truncf %276 : vector<1x8x8xf32> to vector<1x8x8xbf16>
    "tpu.trace_start"() <{level = 10 : i32, message = "bqk,bkd->bqd"}> : () -> ()
    %cst_83 = arith.constant dense<0.000000e+00> : vector<1x8x8xf32>
    %278 = tpu.matmul %277, %263, %cst_83 {dimension_numbers = #tpu.dot_dimension_numbers<[2], [1], [1], [2], [0, 0, 0, 1, 1, 2], [0], [0]>} : vector<1x8x8xbf16>, vector<1x8x8xbf16>, vector<1x8x8xf32> -> vector<1x8x8xf32>
    "tpu.trace_stop"() : () -> ()
    %279 = vector.shape_cast %278 : vector<1x8x8xf32> to vector<8x8xf32>
    %280 = arith.truncf %279 : vector<8x8xf32> to vector<8x8xbf16>
    %281 = vector.extract_strided_slice %194 {offsets = [16, 0], sizes = [8, 32], strides = [1, 1]} : vector<32x32xbf16> to vector<8x32xbf16>
    %cst_84 = arith.constant dense<0.000000e+00> : vector<8x32xf32>
    %282 = tpu.matmul %280, %281, %cst_84 {dimension_numbers = #tpu.dot_dimension_numbers<[1], [0], [0], [1], [0, 0, 1, 1], [], []>} : vector<8x8xbf16>, vector<8x32xbf16>, vector<8x32xf32> -> vector<8x32xf32>
    %283 = arith.addf %254, %282 : vector<8x32xf32>
    %284 = vector.extract_strided_slice %180 {offsets = [0, 24], sizes = [8, 8], strides = [1, 1]} : vector<8x32xf32> to vector<8x8xf32>
    %285 = vector.shape_cast %284 : vector<8x8xf32> to vector<1x8x8xf32>
    %286 = arith.truncf %285 : vector<1x8x8xf32> to vector<1x8x8xbf16>
    %287 = vector.extract_strided_slice %186 {offsets = [0, 24], sizes = [8, 8], strides = [1, 1]} : vector<8x32xf32> to vector<8x8xf32>
    %288 = vector.shape_cast %287 : vector<8x8xf32> to vector<1x8x8xf32>
    %289 = arith.truncf %288 : vector<1x8x8xf32> to vector<1x8x8xbf16>
    %290 = vector.extract_strided_slice %192 {offsets = [0, 24], sizes = [8, 8], strides = [1, 1]} : vector<8x32xf32> to vector<8x8xf32>
    %291 = vector.shape_cast %290 : vector<8x8xf32> to vector<1x8x8xf32>
    %292 = arith.truncf %291 : vector<1x8x8xf32> to vector<1x8x8xbf16>
    "tpu.trace_start"() <{level = 10 : i32, message = "bqd,bkd->bqk"}> : () -> ()
    %cst_85 = arith.constant dense<0.000000e+00> : vector<1x8x8xf32>
    %293 = tpu.matmul %286, %289, %cst_85 {dimension_numbers = #tpu.dot_dimension_numbers<[2], [2], [1], [1], [0, 0, 0, 1, 1, 1], [0], [0]>} : vector<1x8x8xbf16>, vector<1x8x8xbf16>, vector<1x8x8xf32> -> vector<1x8x8xf32>
    "tpu.trace_stop"() : () -> ()
    %cst_86 = arith.constant 0.353553385 : f32
    %294 = vector.broadcast %cst_86 : f32 to vector<1x8x8xf32>
    %295 = arith.mulf %293, %294 : vector<1x8x8xf32>
    %cst_87 = arith.constant dense<0xFF800000> : vector<1x8xf32>
    %296 = vector.multi_reduction <maximumf>, %295, %cst_87 [2] : vector<1x8x8xf32> to vector<1x8xf32>
    %297 = vector.shape_cast %296 : vector<1x8xf32> to vector<1x8x1xf32>
    %298 = vector.broadcast %297 : vector<1x8x1xf32> to vector<1x8x8xf32>
    %299 = arith.subf %295, %298 : vector<1x8x8xf32>
    %300 = math.exp %299 : vector<1x8x8xf32>
    %cst_88 = arith.constant dense<0.000000e+00> : vector<1x8xf32>
    %301 = vector.multi_reduction <add>, %300, %cst_88 [2] : vector<1x8x8xf32> to vector<1x8xf32>
    %302 = vector.shape_cast %301 : vector<1x8xf32> to vector<1x8x1xf32>
    %303 = tpu.reciprocal %302 {approx = true} : vector<1x8x1xf32> -> vector<1x8x1xf32>
    %304 = vector.broadcast %303 : vector<1x8x1xf32> to vector<1x8x8xf32>
    %305 = arith.mulf %300, %304 : vector<1x8x8xf32>
    %306 = arith.truncf %305 : vector<1x8x8xf32> to vector<1x8x8xbf16>
    "tpu.trace_start"() <{level = 10 : i32, message = "bqk,bkd->bqd"}> : () -> ()
    %cst_89 = arith.constant dense<0.000000e+00> : vector<1x8x8xf32>
    %307 = tpu.matmul %306, %292, %cst_89 {dimension_numbers = #tpu.dot_dimension_numbers<[2], [1], [1], [2], [0, 0, 0, 1, 1, 2], [0], [0]>} : vector<1x8x8xbf16>, vector<1x8x8xbf16>, vector<1x8x8xf32> -> vector<1x8x8xf32>
    "tpu.trace_stop"() : () -> ()
    %308 = vector.shape_cast %307 : vector<1x8x8xf32> to vector<8x8xf32>
    %309 = arith.truncf %308 : vector<8x8xf32> to vector<8x8xbf16>
    %310 = vector.extract_strided_slice %194 {offsets = [24, 0], sizes = [8, 32], strides = [1, 1]} : vector<32x32xbf16> to vector<8x32xbf16>
    %cst_90 = arith.constant dense<0.000000e+00> : vector<8x32xf32>
    %311 = tpu.matmul %309, %310, %cst_90 {dimension_numbers = #tpu.dot_dimension_numbers<[1], [0], [0], [1], [0, 0, 1, 1], [], []>} : vector<8x8xbf16>, vector<8x32xbf16>, vector<8x32xf32> -> vector<8x32xf32>
    %312 = arith.addf %283, %311 : vector<8x32xf32>
    %313 = vector.broadcast %195 : vector<1x32xf32> to vector<8x32xf32>
    %314 = arith.addf %312, %313 : vector<8x32xf32>
    %315 = arith.addf %171, %314 : vector<8x32xf32>
    %316 = vector.extract_strided_slice %5 {offsets = [10, 0], sizes = [1, 32], strides = [1, 1]} : vector<16x128xf32> to vector<1x32xf32>
    %317 = vector.extract_strided_slice %5 {offsets = [11, 0], sizes = [1, 32], strides = [1, 1]} : vector<16x128xf32> to vector<1x32xf32>
    %cst_91 = arith.constant dense<0.000000e+00> : vector<8xf32>
    %318 = vector.multi_reduction <add>, %315, %cst_91 [1] : vector<8x32xf32> to vector<8xf32>
    %319 = vector.shape_cast %318 : vector<8xf32> to vector<8x1xf32>
    %cst_92 = arith.constant 3.200000e+01 : f32
    %320 = vector.broadcast %cst_92 : f32 to vector<8x1xf32>
    %321 = arith.divf %319, %320 : vector<8x1xf32>
    %322 = vector.broadcast %321 : vector<8x1xf32> to vector<8x32xf32>
    %323 = arith.subf %315, %322 : vector<8x32xf32>
    %324 = arith.mulf %323, %323 : vector<8x32xf32>
    %cst_93 = arith.constant dense<0.000000e+00> : vector<8xf32>
    %325 = vector.multi_reduction <add>, %324, %cst_93 [1] : vector<8x32xf32> to vector<8xf32>
    %326 = vector.shape_cast %325 : vector<8xf32> to vector<8x1xf32>
    %cst_94 = arith.constant 3.200000e+01 : f32
    %327 = vector.broadcast %cst_94 : f32 to vector<8x1xf32>
    %328 = arith.divf %326, %327 : vector<8x1xf32>
    %329 = vector.broadcast %321 : vector<8x1xf32> to vector<8x32xf32>
    %330 = arith.subf %315, %329 : vector<8x32xf32>
    %cst_95 = arith.constant 9.99999974E-6 : f32
    %331 = vector.broadcast %cst_95 : f32 to vector<8x1xf32>
    %332 = arith.addf %328, %331 : vector<8x1xf32>
    %333 = math.rsqrt %332 : vector<8x1xf32>
    %334 = vector.broadcast %333 : vector<8x1xf32> to vector<8x32xf32>
    %335 = arith.mulf %330, %334 : vector<8x32xf32>
    %336 = vector.broadcast %316 : vector<1x32xf32> to vector<8x32xf32>
    %337 = arith.mulf %335, %336 : vector<8x32xf32>
    %338 = vector.broadcast %317 : vector<1x32xf32> to vector<8x32xf32>
    %339 = arith.addf %337, %338 : vector<8x32xf32>
    %340 = arith.truncf %339 : vector<8x32xf32> to vector<8x32xbf16>
    %c0_96 = arith.constant 0 : index
    %c0_97 = arith.constant 0 : index
    %c0_98 = arith.constant 0 : index
    %341 = vector.load %arg12[%c0_96, %c0_97, %c0_98] : memref<1x32x64xbf16, #tpu.memory_space<vmem>>, vector<1x32x64xbf16>
    %342 = vector.shape_cast %341 : vector<1x32x64xbf16> to vector<32x64xbf16>
    %cst_99 = arith.constant dense<0.000000e+00> : vector<8x64xf32>
    %343 = tpu.matmul %340, %342, %cst_99 {dimension_numbers = #tpu.dot_dimension_numbers<[1], [0], [0], [1], [0, 0, 1, 1], [], []>} : vector<8x32xbf16>, vector<32x64xbf16>, vector<8x64xf32> -> vector<8x64xf32>
    %344 = vector.extract_strided_slice %5 {offsets = [14, 0], sizes = [1, 64], strides = [1, 1]} : vector<16x128xf32> to vector<1x64xf32>
    %345 = vector.broadcast %344 : vector<1x64xf32> to vector<8x64xf32>
    %346 = arith.addf %343, %345 : vector<8x64xf32>
    %cst_100 = arith.constant 0.000000e+00 : f32
    %347 = vector.broadcast %cst_100 : f32 to vector<8x64xf32>
    %348 = arith.maximumf %346, %347 : vector<8x64xf32>
    %349 = arith.truncf %348 : vector<8x64xf32> to vector<8x64xbf16>
    %c0_101 = arith.constant 0 : index
    %c0_102 = arith.constant 0 : index
    %c0_103 = arith.constant 0 : index
    %350 = vector.load %arg13[%c0_101, %c0_102, %c0_103] : memref<1x64x32xbf16, #tpu.memory_space<vmem>>, vector<1x64x32xbf16>
    %351 = vector.shape_cast %350 : vector<1x64x32xbf16> to vector<64x32xbf16>
    %cst_104 = arith.constant dense<0.000000e+00> : vector<8x32xf32>
    %352 = tpu.matmul %349, %351, %cst_104 {dimension_numbers = #tpu.dot_dimension_numbers<[1], [0], [0], [1], [0, 0, 1, 1], [], []>} : vector<8x64xbf16>, vector<64x32xbf16>, vector<8x32xf32> -> vector<8x32xf32>
    %353 = vector.extract_strided_slice %5 {offsets = [15, 0], sizes = [1, 32], strides = [1, 1]} : vector<16x128xf32> to vector<1x32xf32>
    %354 = vector.broadcast %353 : vector<1x32xf32> to vector<8x32xf32>
    %355 = arith.addf %352, %354 : vector<8x32xf32>
    %356 = arith.addf %339, %355 : vector<8x32xf32>
    %357 = vector.extract_strided_slice %5 {offsets = [12, 0], sizes = [1, 32], strides = [1, 1]} : vector<16x128xf32> to vector<1x32xf32>
    %358 = vector.extract_strided_slice %5 {offsets = [13, 0], sizes = [1, 32], strides = [1, 1]} : vector<16x128xf32> to vector<1x32xf32>
    %cst_105 = arith.constant dense<0.000000e+00> : vector<8xf32>
    %359 = vector.multi_reduction <add>, %356, %cst_105 [1] : vector<8x32xf32> to vector<8xf32>
    %360 = vector.shape_cast %359 : vector<8xf32> to vector<8x1xf32>
    %cst_106 = arith.constant 3.200000e+01 : f32
    %361 = vector.broadcast %cst_106 : f32 to vector<8x1xf32>
    %362 = arith.divf %360, %361 : vector<8x1xf32>
    %363 = vector.broadcast %362 : vector<8x1xf32> to vector<8x32xf32>
    %364 = arith.subf %356, %363 : vector<8x32xf32>
    %365 = arith.mulf %364, %364 : vector<8x32xf32>
    %cst_107 = arith.constant dense<0.000000e+00> : vector<8xf32>
    %366 = vector.multi_reduction <add>, %365, %cst_107 [1] : vector<8x32xf32> to vector<8xf32>
    %367 = vector.shape_cast %366 : vector<8xf32> to vector<8x1xf32>
    %cst_108 = arith.constant 3.200000e+01 : f32
    %368 = vector.broadcast %cst_108 : f32 to vector<8x1xf32>
    %369 = arith.divf %367, %368 : vector<8x1xf32>
    %370 = vector.broadcast %362 : vector<8x1xf32> to vector<8x32xf32>
    %371 = arith.subf %356, %370 : vector<8x32xf32>
    %cst_109 = arith.constant 9.99999974E-6 : f32
    %372 = vector.broadcast %cst_109 : f32 to vector<8x1xf32>
    %373 = arith.addf %369, %372 : vector<8x1xf32>
    %374 = math.rsqrt %373 : vector<8x1xf32>
    %375 = vector.broadcast %374 : vector<8x1xf32> to vector<8x32xf32>
    %376 = arith.mulf %371, %375 : vector<8x32xf32>
    %377 = vector.broadcast %357 : vector<1x32xf32> to vector<8x32xf32>
    %378 = arith.mulf %376, %377 : vector<8x32xf32>
    %379 = vector.broadcast %358 : vector<1x32xf32> to vector<8x32xf32>
    %380 = arith.addf %378, %379 : vector<8x32xf32>
    %c0_110 = arith.constant 0 : index
    %c0_111 = arith.constant 0 : index
    %381 = vector.load %arg15[%c0_110, %c0_111] : memref<8x32xf32, #tpu.memory_space<vmem>>, vector<8x32xf32>
    tpu.vector_store %arg15[%c0_110, %c0_111], %380 {strides = array<i32>} : memref<8x32xf32, #tpu.memory_space<vmem>>, vector<8x32xf32>,
    return
  }
  func.func @transform_0(%arg0: i32, %arg1: i32) -> (i32, i32) {
    %c0_i32 = arith.constant 0 : i32
    %c0_i32_0 = arith.constant 0 : i32
    return %arg0, %c0_i32 : i32, i32
  }
  func.func @transform_1(%arg0: i32, %arg1: i32) -> (i32, i32) {
    %c0_i32 = arith.constant 0 : i32
    %c0_i32_0 = arith.constant 0 : i32
    return %arg0, %c0_i32 : i32, i32
  }
  func.func @transform_2(%arg0: i32, %arg1: i32) -> (i32, i32, i32) {
    %c0_i32 = arith.constant 0 : i32
    %c0_i32_0 = arith.constant 0 : i32
    %c0_i32_1 = arith.constant 0 : i32
    return %arg1, %c0_i32, %c0_i32_0 : i32, i32, i32
  }
  func.func @transform_3(%arg0: i32, %arg1: i32) -> (i32, i32, i32) {
    %c0_i32 = arith.constant 0 : i32
    %c0_i32_0 = arith.constant 0 : i32
    %c0_i32_1 = arith.constant 0 : i32
    return %arg1, %c0_i32, %c0_i32_0 : i32, i32, i32
  }
  func.func @transform_4(%arg0: i32, %arg1: i32) -> (i32, i32, i32) {
    %c0_i32 = arith.constant 0 : i32
    %c0_i32_0 = arith.constant 0 : i32
    %c0_i32_1 = arith.constant 0 : i32
    return %arg1, %c0_i32, %c0_i32_0 : i32, i32, i32
  }
  func.func @transform_5(%arg0: i32, %arg1: i32) -> (i32, i32, i32) {
    %c0_i32 = arith.constant 0 : i32
    %c0_i32_0 = arith.constant 0 : i32
    %c0_i32_1 = arith.constant 0 : i32
    return %arg1, %c0_i32, %c0_i32_0 : i32, i32, i32
  }
  func.func @transform_6(%arg0: i32, %arg1: i32) -> (i32, i32, i32) {
    %c0_i32 = arith.constant 0 : i32
    %c0_i32_0 = arith.constant 0 : i32
    %c0_i32_1 = arith.constant 0 : i32
    return %arg1, %c0_i32, %c0_i32_0 : i32, i32, i32
  }
  func.func @transform_7(%arg0: i32, %arg1: i32) -> (i32, i32, i32) {
    %c0_i32 = arith.constant 0 : i32
    %c0_i32_0 = arith.constant 0 : i32
    %c0_i32_1 = arith.constant 0 : i32
    return %arg1, %c0_i32, %c0_i32_0 : i32, i32, i32
  }
  func.func @transform_8(%arg0: i32, %arg1: i32) -> (i32, i32, i32) {
    %c0_i32 = arith.constant 0 : i32
    %c0_i32_0 = arith.constant 0 : i32
    %c0_i32_1 = arith.constant 0 : i32
    return %arg1, %c0_i32, %c0_i32_0 : i32, i32, i32
  }
  func.func @transform_9(%arg0: i32, %arg1: i32) -> (i32, i32, i32) {
    %c0_i32 = arith.constant 0 : i32
    %c0_i32_0 = arith.constant 0 : i32
    %c0_i32_1 = arith.constant 0 : i32
    return %arg1, %c0_i32, %c0_i32_0 : i32, i32, i32
  }
  func.func @transform_10(%arg0: i32, %arg1: i32) -> (i32, i32, i32) {
    %c0_i32 = arith.constant 0 : i32
    %c0_i32_0 = arith.constant 0 : i32
    %c0_i32_1 = arith.constant 0 : i32
    return %arg1, %c0_i32, %c0_i32_0 : i32, i32, i32
  }
  func.func @transform_11(%arg0: i32, %arg1: i32) -> (i32, i32, i32) {
    %c0_i32 = arith.constant 0 : i32
    %c0_i32_0 = arith.constant 0 : i32
    %c0_i32_1 = arith.constant 0 : i32
    return %arg1, %c0_i32, %c0_i32_0 : i32, i32, i32
  }
  func.func @transform_12(%arg0: i32, %arg1: i32) -> (i32, i32, i32) {
    %c0_i32 = arith.constant 0 : i32
    %c0_i32_0 = arith.constant 0 : i32
    %c0_i32_1 = arith.constant 0 : i32
    return %arg1, %c0_i32, %c0_i32_0 : i32, i32, i32
  }
  func.func @transform_13(%arg0: i32, %arg1: i32) -> (i32, i32) {
    %c0_i32 = arith.constant 0 : i32
    %c0_i32_0 = arith.constant 0 : i32
    return %arg0, %c0_i32 : i32, i32
  }
}

</mosaic_0001>

<bundles_post_ra>
// kernel: tpu_custom_call.1
= control target key start
LH: loop header
LB: loop body
LE: loop exit
PB: predicated region body
PF: predicated region fallthrough
CT: control target
= control target key end

     0   :  { %s3661_s0 = inlined_call_operand.hbm [shape: f32[16,32], index: 0, kind: input, shape index: {}]   ;;  %s3662_s1 = inlined_call_operand.hbm [shape: f32[16,32], index: 1, kind: input, shape index: {}]   ;;  %s3663_s2 = inlined_call_operand.vmem [shape: bf16[2,32,32], index: 2, kind: input, shape index: {}]   ;;  %s3664_s3 = inlined_call_operand.vmem [shape: bf16[2,32,32], index: 3, kind: input, shape index: {}]   ;;  %s3665_s4 = inlined_call_operand.vmem [shape: bf16[2,32,32], index: 4, kind: input, shape index: {}]   ;;  %s3666_s5 = inlined_call_operand.hbm [shape: bf16[2,32,32], index: 5, kind: input, shape index: {}]   ;;  %s3667_s6 = inlined_call_operand.hbm [shape: bf16[2,32,32], index: 6, kind: input, shape index: {}]   ;;  %s3668_s7 = inlined_call_operand.hbm [shape: bf16[2,32,32], index: 7, kind: input, shape index: {}]   ;;  %s3669_s8 = inlined_call_operand.hbm [shape: bf16[2,32,32], index: 8, kind: input, shape index: {}]   ;;  %s3670_s9 = inlined_call_operand.hbm [shape: bf16[2,32,32], index: 9, kind: input, shape index: {}]   ;;  %s3671_s10 = inlined_call_operand.hbm [shape: bf16[2,32,64], index: 10, kind: input, shape index: {}]   ;;  %s3672_s11 = inlined_call_operand.vmem [shape: bf16[2,64,32], index: 11, kind: input, shape index: {}]   ;;  %s3673_s12 = inlined_call_operand.hbm [shape: f32[2,16,128], index: 12, kind: input, shape index: {}]   ;;  %s3674_s13 = inlined_call_operand.hbm [shape: f32[16,32], index: 13, kind: output, shape index: {}]  }
   0x1   :  { %3697 = sst [smem:[#allocation39_spill]] %s3661_s0 }
   0x2   :  { %3698 = sst [smem:[#allocation40_spill]] %s3662_s1 }
   0x3   :  { %3699 = sst [smem:[#allocation41_spill]] %s3663_s2 }
   0x4   :  { %3700 = sst [smem:[#allocation42_spill]] %s3664_s3 }
   0x5   :  { %3701 = sst [smem:[#allocation43_spill]] %s3665_s4 }
   0x6   :  { %3702 = sst [smem:[#allocation44_spill]] %s3666_s5 }
   0x7   :  { %3703 = sst [smem:[#allocation45_spill]] %s3667_s6 }
   0x8   :  { %3704 = sst [smem:[#allocation46_spill]] %s3668_s7 }
   0x9   :  { %3705 = sst [smem:[#allocation47_spill]] %s3669_s8 }
   0xa   :  { %3706 = sst [smem:[#allocation48_spill]] %s3671_s10 }
   0xb   :  { %3707 = sst [smem:[#allocation49_spill]] %s3672_s11 }
   0xc   :  { %3708 = sst [smem:[#allocation50_spill]] %s3674_s13 }
   0xd   :  { %18 = vsyncpa [#allocation3], 0 }
   0xe   :  { %20 = vsyncpa [#allocation3 + $0x1], 0 }
   0xf   :  { %21 = vsyncpa [#allocation6], 0 }
  0x10   :  { %23 = vsyncpa [#allocation6 + $0x1], 0 }
  0x11   :  { %24 = vsyncpa [#allocation9], 0 }
  0x12   :  { %26 = vsyncpa [#allocation9 + $0x1], 0 }
  0x13   :  { %27 = vsyncpa [#allocation12], 0 }
  0x14   :  { %29 = vsyncpa [#allocation12 + $0x1], 0 }
  0x15   :  { %30 = vsyncpa [#allocation15], 0 }
  0x16   :  { %32 = vsyncpa [#allocation15 + $0x1], 0 }
  0x17   :  { %33 = vsyncpa [#allocation4], 0 }
  0x18   :  { %35 = vsyncpa [#allocation4 + $0x1], 0  ;;  %s3082_s25 = smov 0   ;;  %s3084_s26 = smov 0  }
  0x19   :  { %s3086_s27 = smov 0   ;;  %s3088_s28 = smov 0  }
  0x1a   :  { %s3090_s29 = smov 0   ;;  %s3092_s30 = smov 0  }
  0x1b   :  { %s3094_s14 = smov 0   ;;  %s3096_s15 = smov 0  }
  0x1c   :  { %s3098_s16 = smov 0   ;;  %s3100_s17 = smov 0  }
  0x1d   :  { %s3102_s18 = smov 0  }
  0x1e LB: > { %3709 = sst [smem:[#allocation25_spill]] %s2966_s26  ;;  %s3138_s19 = sadd.s32 4294967295, %s3002_s18   ;;  %s3002_s18 = sphi %s3102_s18, %s41_s18   ;;  %s2998_s17 = sphi %s3100_s17, %s3780_s17   ;;  %s2994_s16 = sphi %s3098_s16, %s3774_s16   ;;  %s2990_s15 = sphi %s3096_s15, %s3779_s15   ;;  %s2986_s14 = sphi %s3094_s14, %s3773_s14   ;;  %s2982_s30 = sphi %s3092_s30, %s3778_s30   ;;  %s2978_s29 = sphi %s3090_s29, %s3777_s29   ;;  %s2974_s28 = sphi %s3088_s28, %s3776_s28   ;;  %s2970_s27 = sphi %s3086_s27, %s3771_s27   ;;  %s2966_s26 = sphi %s3084_s26, %s3770_s26   ;;  %s2962_s25 = sphi %s3082_s25, %s3769_s25  }
  0x1f   : > { %3710 = sst [smem:[#allocation26_spill]] %s2970_s27  ;;  %s2215_s20 = sadd.s32 4294967294, %s3002_s18  }
  0x20   : > { %3711 = sst [smem:[#allocation27_spill]] %s2974_s28  ;;  %s50_s21 = sadd.s32 1, %s2994_s16 }
  0x21   : > { %3712 = sst [smem:[#allocation28_spill]] %s2986_s14  ;;  %s53_s22 = sadd.s32 1, %s2998_s17 }
  0x22   : > { %3713 = sst [smem:[#allocation29_spill]] %s2990_s15  ;;  %p51_p0 = scmp.ge.s32.totalorder %s50_s21, 2 }
  0x23   : > { %3714 = sst [smem:[#allocation30_spill]] %s2994_s16  ;;  %s60_s23 = sadd.s32 1, %s2982_s30 }
  0x24   : > { %3715 = sst [smem:[#allocation31_spill]] %s3002_s18  ;;  %p67_p1 = scmp.ne.s32.totalorder %s2982_s30, %s2978_s29 }
  0x25   : > { %p68_p2 = scmp.eq.s32.totalorder %s3002_s18, 0  ;;  %s3782_s21 = smov (%p51_p0, %s50_s21), 0 }
  0x26   : > { %3716 = sst [smem:[#allocation32_spill]] %s3782_s21  ;;  %s3784_s22 = smov (!%p51_p0, %s53_s22), %s2998_s17 }
  0x27   : > { %p3155_p3 = por %p68_p2, %p67_p1  ;;  %p3677_p4 = scmp.ne.s32.totalorder %s2978_s29, %s2974_s28 }
  0x28   : > { %p55_p5 = scmp.ge.s32.totalorder %s3784_s22, 2  ;;  %p74_p6 = scmp.eq.s32.totalorder %s3138_s19, 0 }
  0x29   : > { %s187_s13 = ssub.s32 %s2994_s16, %s3782_s21  ;;  %s190_s15 = sadd.s32 1, %s2970_s27 }
  0x2a   : > { %s3786_s22 = smov (%p55_p5, %s3784_s22), 0  ;;  %p3172_p7 = por %p74_p6, %p3677_p4 }
  0x2b   : > { %3718 = sst [smem:[#allocation33_spill]] %s3786_s22  ;;  %p188_p8 = scmp.eq.s32.totalorder %s187_s13, 0 }
  0x2c   : > { %s57_s4 = ssub.s32 %s2998_s17, %s3786_s22  ;;  %p197_p9 = scmp.ne.s32.totalorder %s2970_s27, %s2966_s26 }
  0x2d   : > { %p58_p10 = scmp.eq.s32.totalorder %s57_s4, 0  ;;  %p203_p11 = scmp.ne.s32.totalorder %s2966_s26, %s2962_s25 }
  0x2e   : > { %s3183_s21 = scalar_select %p188_p8, %s2970_s27, %s190_s15  }
  0x2f   : > { %s3186_s3 = scalar_select %p58_p10, %s2982_s30, %s60_s23  }
  0x30   : > { %3720 = sst [smem:[#allocation34_spill]] %s3183_s21  ;;  %p3190_p12 = por %p197_p9, %p68_p2 }
  0x31   : > { %3721 = sst [smem:[#allocation35_spill]] %s3186_s3  ;;  %p3196_p13 = por %p203_p11, %p74_p6 }
  0x32   : > { %p409_p0 = scmp.eq.s32.totalorder %s3138_s19, 3  ;;  %p415_p5 = scmp.eq.s32.totalorder %s2215_s20, 3 }
  0x33   : > { %s3723_s13 = scalar_select %p3196_p13, 1, 0 }
  0x34   : > { %p2452_p4 = scmp.lt.s32.totalorder %s3002_s18, 4  ;;  %p3205_p8 = por %p409_p0, %p67_p1 }
  0x35   : > { %3724 = sst [smem:[#allocation36_spill]] %s3723_s13  ;;  %p3727_p10 = scmp.ne.s32.totalorder %s2978_s29, %s2974_s28 }
  0x36   : > { %s3725_s4 = scalar_select %p3205_p8, 1, 0 }
  0x37   : > { %p3212_p2 = por %p415_p5, %p3727_p10  ;;  %s3681_s15 = sand.u32 1, %s2982_s30  }
  0x38   : > { %3726 = sst [smem:[#allocation37_spill]] %s3725_s4  ;;  %s3687_s23 = sshll.u32 %s2998_s17, 3 }
  0x39   : > { %s3728_s25 = scalar_select %p3212_p2, 1, 0 }
  0x3a   : > { %s3220_s22 = sshll.u32 %s3681_s15, 3  ;;  %p3226_p1 = pnand %p2452_p4, %p3155_p3 }
  0x3b   : > { %3729 = sst [smem:[#allocation38_spill]] %s3728_s25  ;;  %s3231_s3 = sand.u32 1, %s3002_s18  }
  0x3c   : > { %s3731_s1 = sld [smem:[#allocation40_spill]]  ;;  %s458_s15 = scalar_lea.vmem [#allocation5], %s3220_s22 }
  0x3d   : > { %s466_s4 = sshll.u32 %s458_s15, 4  ;;  %p3243_p3 = pnand %p2452_p4, %p3190_p12  ;;  %s467_s4 = int_to_ptr.vmem [resolvable:$true] %s466_s4 }
  0x3e   : > { %s3688_s13 = scalar_lea.sflag [#allocation6], %s3231_s3  ;;  %p2243_p6 = scmp.ge.s32.totalorder %s3002_s18, 1 }
  0x3f   : > { %p657_p9 = scmp.lt.s32.totalorder %s3002_s18, 5  ;;  %s499_s21 = sand.u32 1, %s2970_s27  }
  0x40   : > { %s3255_s25 = sshll.u32 %s499_s21, 4  ;;  %s3258_s2 = sshll.u32 %s2994_s16, 4 }
  0x41   : > { %p3260_p4 = pnand %p2243_p6, %p657_p9  ;;  %s3734_s6 = sld [smem:[#allocation45_spill]] }
  0x42   : > { %s462_s28 = scalar_lea.hbm %s3731_s1, %s3687_s23  ;;  %s523_s21 = scalar_lea.vmem [#allocation8], %s3255_s25 }
  0x43   : > { %s464_s24 = sshll.u32 %s462_s28, 4  ;;  %s3694_s1 = scalar_lea.sflag [#allocation9], %s3231_s3  ;;  %s465_s24 = int_to_ptr.hbm [resolvable:$true] %s464_s24 }
  0x44   : > { %2426 = dma.hbm_to_vmem [thread:$0]  (!%p3226_p1), %s465_s24, 128, %s467_s4, %s3688_s13  }
  0x45   : > { %s531_s13 = sshll.u32 %s523_s21, 4  ;;  %s3004_s16 = smov 64   ;;  %s532_s13 = int_to_ptr.vmem [resolvable:$true] %s531_s13 }
  0x46   : > { %s3005_s27 = smov 4   ;;  %s3735_s8 = sld [smem:[#allocation47_spill]] }
  0x47   : > { %s528_s4 = scalar_lea.hbm %s3734_s6, %s3258_s2  ;;  %s567_s21 = scalar_lea.vmem [#allocation11], %s3255_s25 }
  0x48   : > { %s529_s24 = sshll.u32 %s528_s4, 4  ;;  %s575_s6 = sshll.u32 %s567_s21, 4  ;;  %s530_s24 = int_to_ptr.hbm [resolvable:$true] %s529_s24  ;;  %s576_s6 = int_to_ptr.vmem [resolvable:$true] %s575_s6 }
  0x49   : > { %2432 = dma.hbm_to_vmem [thread:$0]  (!%p3243_p3), %s530_s24, 256, %s532_s13, %s3694_s1, %s3004_s16, %s3004_s16, %s3005_s27  }
  0x4a   : > { %s3695_s26 = scalar_lea.sflag [#allocation12], %s3231_s3  ;;  %s3736_s10 = sld [smem:[#allocation48_spill]] }
  0x4b   : > { %s611_s21 = scalar_lea.vmem [#allocation14], %s3255_s25  ;;  %s3696_s1 = scalar_lea.sflag [#allocation15], %s3231_s3 }
  0x4c   : > { %s572_s4 = scalar_lea.hbm %s3735_s8, %s3258_s2  ;;  %s3738_s0 = sld [smem:[#allocation39_spill]] }
  0x4d   : > { %s573_s18 = sshll.u32 %s572_s4, 4  ;;  %s619_s4 = sshll.u32 %s611_s21, 4  ;;  %s574_s18 = int_to_ptr.hbm [resolvable:$true] %s573_s18  ;;  %s620_s4 = int_to_ptr.vmem [resolvable:$true] %s619_s4 }
  0x4e   : > { %2438 = dma.hbm_to_vmem [thread:$0]  (!%p3243_p3), %s574_s18, 256, %s576_s6, %s3695_s26, %s3004_s16, %s3004_s16, %s3005_s27  }
  0x4f   : > { %s3737_s6 = sshll.u32 %s2998_s17, 3  ;;  %s3739_s8 = sand.u32 1, %s2982_s30  }
  0x50   : > { %s616_s23 = scalar_lea.hbm %s3736_s10, %s3258_s2  ;;  %s436_s10 = scalar_lea.sflag [#allocation3], %s3739_s8 }
  0x51   : > { %s617_s15 = sshll.u32 %s616_s23, 4  ;;  %s439_s23 = scalar_lea.vmem [#allocation2], %s3220_s22  ;;  %s618_s15 = int_to_ptr.hbm [resolvable:$true] %s617_s15 }
  0x52   : > { %2444 = dma.hbm_to_vmem [thread:$0]  (!%p3243_p3), %s618_s15, 256, %s620_s4, %s3696_s1, %s3004_s16, %s3004_s16, %s3005_s27  }
  0x53   : > { %s443_s24 = scalar_lea.hbm %s3738_s0, %s3737_s6  ;;  %s447_s21 = sshll.u32 %s439_s23, 4  ;;  %s448_s21 = int_to_ptr.vmem [resolvable:$true] %s447_s21 }
  0x54   : > { %s445_s26 = sshll.u32 %s443_s24, 4  ;;  %s3740_s5 = sld [smem:[#allocation44_spill]]  ;;  %s446_s26 = int_to_ptr.hbm [resolvable:$true] %s445_s26 }
  0x55   : > { %2423 = dma.hbm_to_vmem [thread:$0]  (!%p3226_p1), %s446_s26, 128, %s448_s21, %s436_s10  }
  0x56   : > { %s501_s13 = scalar_lea.vmem [#allocation7], %s3255_s25  ;;  %s3741_s8 = scalar_lea.sflag [#allocation6], %s3231_s3 }
  0x57   : > { %s509_s6 = sshll.u32 %s501_s13, 4  ;;  %s3742_s7 = sld [smem:[#allocation46_spill]]  ;;  %s510_s6 = int_to_ptr.vmem [resolvable:$true] %s509_s6 }
  0x58   : > { %s545_s20 = scalar_lea.vmem [#allocation10], %s3255_s25  ;;  %s3743_s21 = scalar_lea.sflag [#allocation9], %s3231_s3 }
  0x59   : > { %s553_s24 = sshll.u32 %s545_s20, 4  ;;  %s641_s20 = scalar_lea.vmem [#allocation16], %s3255_s25  ;;  %s554_s24 = int_to_ptr.vmem [resolvable:$true] %s553_s24 }
  0x5a   : > { %s506_s18 = scalar_lea.hbm %s3740_s5, %s3258_s2  ;;  %s3007_s15 = smov 8  }
  0x5b   : > { %s507_s1 = sshll.u32 %s506_s18, 4  ;;  %s589_s18 = scalar_lea.vmem [#allocation13], %s3255_s25  ;;  %s508_s1 = int_to_ptr.hbm [resolvable:$true] %s507_s1 }
  0x5c   : > { %2429 = dma.hbm_to_vmem [thread:$0]  (!%p3243_p3), %s508_s1, 256, %s510_s6, %s3741_s8, %s3004_s16, %s3004_s16, %s3005_s27  }
  0x5d   : > { %s550_s22 = scalar_lea.hbm %s3742_s7, %s3258_s2  ;;  %s594_s1 = scalar_lea.hbm %s3670_s9, %s3258_s2 }
  0x5e   : > { %s551_s23 = sshll.u32 %s550_s22, 4  ;;  %s597_s13 = sshll.u32 %s589_s18, 4  ;;  %s552_s23 = int_to_ptr.hbm [resolvable:$true] %s551_s23  ;;  %s598_s13 = int_to_ptr.vmem [resolvable:$true] %s597_s13 }
  0x5f   : > { %2435 = dma.hbm_to_vmem [thread:$0]  (!%p3243_p3), %s552_s23, 256, %s554_s24, %s3743_s21, %s3004_s16, %s3004_s16, %s3005_s27  }
  0x60   : > { %s595_s6 = sshll.u32 %s594_s1, 4  ;;  %s3744_s8 = scalar_lea.sflag [#allocation12], %s3231_s3  ;;  %s596_s6 = int_to_ptr.hbm [resolvable:$true] %s595_s6 }
  0x61   : > { %2441 = dma.hbm_to_vmem [thread:$0]  (!%p3243_p3), %s596_s6, 256, %s598_s13, %s3744_s8, %s3004_s16, %s3004_s16, %s3005_s27  }
  0x62   : > { %s646_s22 = scalar_lea.hbm %s3673_s12, %s3258_s2  ;;  %s649_s24 = sshll.u32 %s641_s20, 4  ;;  %s650_s24 = int_to_ptr.vmem [resolvable:$true] %s649_s24 }
  0x63   : > { %s647_s23 = sshll.u32 %s646_s22, 4  ;;  %s3006_s21 = smov 128   ;;  %s648_s23 = int_to_ptr.hbm [resolvable:$true] %s647_s23 }
  0x64   : > { %s3745_s4 = scalar_lea.sflag [#allocation15], %s3231_s3  ;;  %661 = sbr.rel (%p3260_p4) target bundleno = 3907 (0xf43), region = 72 }
  0x65   : > { %2447 = dma.hbm_to_vmem [thread:$0]  (!%p3243_p3), %s648_s23, 256, %s650_s24, %s3745_s4, %s3006_s21, %s3006_s21, %s3007_s15  }
  0x66   : > { %s3361_s27 = sand.u32 (!%p3260_p4), 1, %s2978_s29  }
  0x67   : > { %s3364_s16 = sshll.u32 (!%p3260_p4), %s3361_s27, 3  ;;  %s664_s25 = scalar_lea.sflag (!%p3260_p4), [#allocation3], %s3361_s27 }
  0x69   : > { %2933 = dma.done.wait (%p3172_p7), %s664_s25, 128  }
  0x6a   : > { %2935 = vsyncadd (%p3172_p7), %s664_s25, 4294967168  ;;  %s673_s3 = sand.u32 1, %s3138_s19  }
  0x6b   : > { %s674_s14 = scalar_lea.sflag [#allocation6], %s673_s3 }
  0x6c   : > { %2937 = dma.done.wait (%p3172_p7), %s674_s14, 128  }
  0x6d   : > { %2939 = vsyncadd (%p3172_p7), %s674_s14, 4294967168  ;;  %s3746_s1 = sld [smem:[#allocation25_spill]] }
  0x73   : > { %s685_s13 = sand.u32 1, %s3746_s1  }
  0x74   : > { %s3379_s6 = sshll.u32 %s685_s13, 4 }
  0x75   : > { %s3382_s8 = scalar_lea.vmem [#allocation7], %s3379_s6 }
  0x76   : > { %2941 = dma.done.wait (%p3196_p13), %s674_s14, 256  }
  0x77   : > { %2943 = vsyncadd (%p3196_p13), %s674_s14, 4294967040  ;;  %s694_s19 = scalar_lea.sflag [#allocation9], %s673_s3 }
  0x78   : > { %2945 = dma.done.wait (%p3196_p13), %s694_s19, 512  }
  0x79   : > { %2947 = vsyncadd (%p3196_p13), %s694_s19, 4294966784  ;;  %s714_s26 = scalar_lea.sflag [#allocation12], %s673_s3 }
  0x7a   : > { %2949 = dma.done.wait (%p3196_p13), %s714_s26, 512  }
  0x7b   : > { %2951 = vsyncadd (%p3196_p13), %s714_s26, 4294966784  ;;  %s3400_s20 = scalar_lea.vmem [#allocation13], %s3379_s6  ;;  %s734_s24 = scalar_lea.sflag [#allocation15], %s673_s3 }
  0x7c   : > { %2953 = dma.done.wait (%p3196_p13), %s734_s24, 512  }
  0x7d   : > { %2955 = vsyncadd (%p3196_p13), %s734_s24, 4294966784  ;;  %s3748_s21 = sld [smem:[#allocation28_spill]]  ;;  %s747_s7 = scalar_lea.vmem [#allocation16], %s3379_s6 }
  0x7e   : > { %s3749_s13 = sld [smem:[#allocation41_spill]] }
  0x7f   : > { %s3750_s23 = sld [smem:[#allocation42_spill]] }
  0x80   : > { %s3751_s18 = sld [smem:[#allocation43_spill]] }
  0x81   : > { %s3752_s0 = sld [smem:[#allocation49_spill]] }
  0x83   : > { %p851_p7 = scmp.lt.s32.totalorder %s3748_s21, 1  ;;  %p2262_p11 = scmp.ne.s32.totalorder %s3748_s21, 0 }
  0x84   : > { %s3753_s14 = scalar_lea.vmem (!%p2262_p11), [#allocation2], %s3364_s16 }
  0x85   : > { %s852_s15 = scalar_select %p851_p7, %s3748_s21, 1 }
  0x86   : > { %875 = sbr.rel (%p2262_p11) target bundleno = 141 (0x8d), region = 112 }
  0x87   : > { %s2378_s4 = sshll.u32 %s852_s15, 4  ;;  %s2381_s25 = sshll.u32 %s852_s15, 5 }
  0x88   : > { %s855_s19 = scalar_lea.vmem %s3749_s13, %s2378_s4  ;;  %s860_s22 = scalar_lea.vmem %s3750_s23, %s2378_s4 }
  0x89   : > { %s3418_s24 = scalar_lea.vmem %s3751_s18, %s2378_s4  ;;  %s3423_s5 = scalar_lea.vmem %s3752_s0, %s2381_s25 }
  0x8a   : > { %s3427_s15 = scalar_lea.vmem [#allocation17], %s3364_s16 }
  0x8b   : > { %v876_v0 = vld [vmem:[%s3753_s14] sm:$0xff]  ;;  %vm877_vm0 = vcmask 261120  }
  0x8c   : > { %878 = vst.msk [vmem:[%s3427_s15] sm:$0xff] %vm877_vm0, %v876_v0 }
  0x8d PF: > { %v2383_v1 = vld [vmem:[%s855_s19 + $0x8] sm:$0xff]  ;;  %v2382_v3 = vld [vmem:[%s855_s19] sm:$0xff]  ;;  %vm900_vm1 = vcmask 261120   ;;  %vm984_vm2 = vcmask 64512   ;;  %s3008_s0 = smov 112   ;;  %s3009_s2 = smov 120  }
  0x8e   : > { %v2385_v2 = vld [vmem:[%s860_s22 + $0x8] sm:$0xff]  ;;  %910 = vmatpush.bf16.msra.mxu0 %v2383_v1  ;;  %v2384_v4 = vld [vmem:[%s860_s22] sm:$0xff]  ;;  %s3010_s28 = smov 104   ;;  %vm1020_vm3 = vcmask 1043456   ;;  %s3756_s11 = scalar_lea.vmem [#allocation5], %s3364_s16  ;;  %vm1852_vm11 = vcmask 523264  }
  0x8f   : > { %940 = vmatpush.bf16.msra.mxu1 %v2385_v2  ;;  %v3442_v7 = vld [vmem:[%s747_s7] sm:$0xff]  ;;  %v2387_v23 = vld [vmem:[%s3418_s24 + $0x8] sm:$0xff]  ;;  %s3757_s22 = scalar_lea.vmem [#allocation8], %s3379_s6  ;;  %s3764_s1 = sld [smem:[#allocation50_spill]] }
  0x90   : > { %v887_v8 = vperm.slane %v3442_v7, 0  ;;  %v921_v9 = vperm.slane %v3442_v7, 1  ;;  %970 = vmatpush.bf16.msra.mxu2 %v2387_v23  ;;  %v2386_v25 = vld [vmem:[%s3418_s24] sm:$0xff]  ;;  %v951_v49 = vperm.slane %v3442_v7, 2  ;;  %s3758_s23 = smov %s3757_s22  ;;  %s1910_s26 = sshll.u32 %s3427_s15, 4  ;;  %s1911_s26 = int_to_ptr.vmem [resolvable:$true] %s1910_s26 }
  0x91   : > { %v977_v56 = vld [vmem:[%s3382_s8] sm:$0xf]  ;;  %s1898_s18 = scalar_lea.sflag [#allocation4], %s3361_s27 }
  0x92   : > { %911 = vmatpush.bf16.msra.mxu0 %v2382_v3  ;;  %v1128_v57 = vsel %vm1020_vm3, %v977_v56, 0 }
  0x93   : > { %v3434_v5 = vld [vmem:[%s3427_s15] sm:$0xff]  ;;  %941 = vmatpush.bf16.msra.mxu1 %v2384_v4 }
  0x94   : > { %v882_v6 = vpack.c.bf16 %v3434_v5, %v3434_v5  ;;  %971 = vmatpush.bf16.msra.mxu2 %v2386_v25 }
  0x96   : > { %2271 = vmatmul.msk.bf16.vlgmr.msra.gmra.mxu0 %vm900_vm1, %v882_v6  ;;  %2280 = vmatmul.msk.bf16.vlgmr.msra.gmra.mxu1 %vm900_vm1, %v882_v6 }
  0x97   : > { %2289 = vmatmul.msk.bf16.vlgmr.msra.gmra.mxu2 %vm900_vm1, %v882_v6 }
 0x113   : > { %v913_v10 = vpop.f32.mrf.mxu0  ;;  %v943_v11 = vpop.f32.mrf.mxu1 }
 0x114   : > { %v914_v12 = vadd.f32 %v913_v10, %v887_v8  ;;  %v944_v13 = vadd.f32 %v943_v11, %v921_v9 }
 0x116   : > { %v982_v14 = vpack.c.bf16 %v944_v13, %v944_v13  ;;  %v981_v15 = vpack.c.bf16 %v914_v12, %v914_v12 }
 0x118   : > { %v1044_v16 = vunpack.c.l.b16 %v982_v14  ;;  %v989_v17 = vsel %vm984_vm2, %v982_v14, 0  ;;  %v1039_v21 = vunpack.c.l.b16 %v981_v15 }
 0x119   : > { %998 = vmatpush.bf16.xpose.msra.mxu3 %v989_v17 }
 0x11a   : > { %v1045_v18 = vpack.c.b16 %v1044_v16, %v1044_v16  ;;  %v1040_v22 = vpack.c.b16 %v1039_v21, %v1039_v21  ;;  %v973_v48 = vpop.f32.mrf.mxu2 }
 0x11b   : > { %v915_v19 = vpop.f32.mrf.mxu0  ;;  %v945_v20 = vpop.f32.mrf.mxu1  ;;  %v974_v51 = vadd.f32 %v973_v48, %v951_v49 }
 0x11c   : > { %1145 = vrot.lane.b32.xlu2 %v1045_v18, %s3008_s0  ;;  %1046 = vrot.lane.b32.xlu1 %v1045_v18, %s3009_s2 }
 0x11d   : > { %v983_v52 = vpack.c.bf16 %v974_v51, %v974_v51 }
 0x11f   : > { %v1022_v53 = vsel %vm1020_vm3, %v983_v52, 0  ;;  %v1081_v9 = vunpack.c.l.b16 %v983_v52 }
 0x120   : > { %2290 = vmatmul.msk.bf16.vlgmr.msra.gmra.mxu3 %vm984_vm2, %v981_v15  ;;  %1031 = vmatpush.bf16.msrb.mxu0 %v1022_v53 }
 0x121   : > { %v1082_v11 = vpack.c.b16 %v1081_v9, %v1081_v9 }
 0x122   : > { %v975_v50 = vpop.f32.mrf.mxu2 }
 0x124   : > { %1143 = vrot.lane.b32.xlu2 %v1040_v22, %s3008_s0  ;;  %1041 = vrot.lane.b32.xlu1 %v1040_v22, %s3009_s2 }
 0x125   : > { %1137 = vmatpush.bf16.msra.mxu0 %v1128_v57 }
 0x12c   : > { %1221 = vrot.lane.b32.xlu1 %v1040_v22, %s3010_s28 }
 0x176   : > { %v1146_v24 = vpop.permute.xlu2 %1145 }
 0x177   : > { %v1151_v28 = vsel %vm984_vm2, %v1146_v24, 0 }
 0x17e   : > { %v1144_v32 = vpop.permute.xlu2 %1143 }
 0x18e   : > { %v1047_v26 = vpop.permute.xlu1 %1046 }
 0x18f   : > { %v1052_v27 = vsel %vm984_vm2, %v1047_v26, 0 }
 0x190   : > { %1061 = vmatpush.bf16.xpose.msrb.mxu1 %v1052_v27 }
 0x196   : > { %v1042_v29 = vpop.permute.xlu1 %1041 }
 0x197   : > { %2292 = vmatmul.msk.bf16.vlgmr.msrb.gmra.mxu1 %vm984_vm2, %v1042_v29 }
 0x198   : > { %1160 = vmatpush.bf16.xpose.msra.mxu1 %v1151_v28  ;;  %v978_v28 = vld [vmem:[%s3382_s8 + $0x4] sm:$0xf] }
 0x199   : > { %v1109_v29 = vsel %vm1020_vm3, %v978_v28, 0 }
 0x19a   : > { %1118 = vmatpush.bf16.msrb.mxu3 %v1109_v29 }
 0x19e   : > { %v1222_v59 = vpop.permute.xlu1 %1221 }
 0x1a3   : > { %v1000_v30 = vpop.f32.mrf.mxu3 }
 0x1a4   : > { %v1004_v31 = vmul.f32 0.35355338, %v1000_v30  ;;  %v979_v30 = vld [vmem:[%s3382_s8 + $0x8] sm:$0xf] }
 0x1a6   : > { %v1005_v33 = vsel %vm984_vm2, %v1004_v31, -inf }
 0x1a7   : > { %2296 = vmatmul.msk.bf16.vlgmr.msra.gmra.mxu1 %vm984_vm2, %v1144_v32  ;;  %1006 = vmax.xlane.f32.xlu0 %v1005_v33 }
 0x1ab   : > { %v1002_v34 = vpop.f32.mrf.mxu3 }
 0x214   : > { %v1063_v35 = vpop.f32.mrf.mxu1 }
 0x215   : > { %v1067_v36 = vmul.f32 0.35355338, %v1063_v35 }
 0x217   : > { %v1068_v37 = vsel %vm984_vm2, %v1067_v36, -inf }
 0x218   : > { %1069 = vmax.xlane.f32.xlu2 %v1068_v37 }
 0x21a   : > { %v1007_v38 = vpop.xlane.xlu0 %1006 }
 0x21b   : > { %v1008_v39 = vsub.f32 %v1004_v31, %v1007_v38  ;;  %v1205_v31 = vsel %vm1020_vm3, %v979_v30, 0 }
 0x21c   : > { %v1065_v40 = vpop.f32.mrf.mxu1  ;;  %1214 = vmatpush.bf16.msra.mxu3 %v1205_v31 }
 0x21d   : > { %v1009_v41 = vmul.f32 1.442695, %v1008_v39 }
 0x21f   : > { %2550 = vpow2.f32 %v1009_v41 }
 0x224   : > { %v1162_v42 = vpop.f32.mrf.mxu1 }
 0x225   : > { %v2551_v43 = vpop.eup %2550  ;;  %v1166_v44 = vmul.f32 0.35355338, %v1162_v42 }
 0x226   : > { %v1011_v45 = vsel %vm984_vm2, %v2551_v43, 0.0 }
 0x227   : > { %1012 = vadd.xlane.f32.xlu0 %v1011_v45  ;;  %v1167_v46 = vsel %vm984_vm2, %v1166_v44, -inf }
 0x228   : > { %1168 = vmax.xlane.f32.xlu1 %v1167_v46 }
 0x22c   : > { %v1164_v47 = vpop.f32.mrf.mxu1 }
 0x23b   : > { %1223 = vrot.lane.b32.xlu0 %v1045_v18, %s3010_s28 }
 0x28b   : > { %v1070_v54 = vpop.xlane.xlu2 %1069 }
 0x28c   : > { %v1071_v55 = vsub.f32 %v1067_v36, %v1070_v54 }
 0x28e   : > { %v1072_v58 = vmul.f32 1.442695, %v1071_v55 }
 0x290   : > { %2552 = vpow2.f32 %v1072_v58 }
 0x296   : > { %v2553_v60 = vpop.eup %2552 }
 0x297   : > { %v1074_v61 = vsel %vm984_vm2, %v2553_v60, 0.0 }
 0x298   : > { %1075 = vadd.xlane.f32.xlu2 %v1074_v61  ;;  %v980_v61 = vld [vmem:[%s3382_s8 + $0xc] sm:$0xf]  ;;  %s3754_s8 = scalar_lea.vmem [#allocation10], %s3379_s6 }
 0x299   : > { %s3755_s10 = smov %s3754_s8 }
 0x29a   : > { %v1013_v62 = vpop.xlane.xlu0 %1012 }
 0x29b   : > { %2554 = vrcp.f32 %v1013_v62  ;;  %v1169_v63 = vpop.xlane.xlu1 %1168  ;;  %v1283_v62 = vsel %vm1020_vm3, %v980_v61, 0 }
 0x29c   : > { %v1170_v0 = vsub.f32 %v1166_v44, %v1169_v63 }
 0x29e   : > { %v1171_v1 = vmul.f32 1.442695, %v1170_v0 }
 0x2a0   : > { %2556 = vpow2.f32 %v1171_v1 }
 0x2a1   : > { %v2555_v2 = vpop.eup %2554 }
 0x2a2   : > { %v1015_v3 = vmul.f32 %v2555_v2, %v2551_v43  ;;  %v1299_v2 = vperm.slane %v3442_v7, 3 }
 0x2a4   : > { %v1016_v4 = vpack.c.bf16 %v1015_v3, %v1015_v3 }
 0x2a6   : > { %v2557_v6 = vpop.eup %2556  ;;  %2291 = vmatmul.msk.bf16.vlgmr.msrb.gmra.mxu0 %vm984_vm2, %v1016_v4 }
 0x2a7   : > { %v1173_v8 = vsel %vm984_vm2, %v2557_v6, 0.0 }
 0x2a8   : > { %1174 = vadd.xlane.f32.xlu1 %v1173_v8 }
 0x2ad   : > { %v1224_v10 = vpop.permute.xlu0 %1223 }
 0x2ae   : > { %v1229_v12 = vsel %vm984_vm2, %v1224_v10, 0 }
 0x2af   : > { %1238 = vmatpush.bf16.xpose.msrb.mxu0 %v1229_v12 }
 0x2b0   : > { %1083 = vrot.lane.b32.xlu2 %v1082_v11, %s3009_s2 }
 0x2c1   : > { %1179 = vrot.lane.b32.xlu1 %v1082_v11, %s3008_s0 }
 0x30b   : > { %v1076_v13 = vpop.xlane.xlu2 %1075 }
 0x30c   : > { %2558 = vrcp.f32 %v1076_v13 }
 0x312   : > { %v2559_v14 = vpop.eup %2558 }
 0x313   : > { %v1078_v15 = vmul.f32 %v2559_v14, %v2553_v60  ;;  %v1084_v16 = vpop.permute.xlu2 %1083 }
 0x314   : > { %v1089_v17 = vsel %vm1020_vm3, %v1084_v16, 0 }
 0x315   : > { %1098 = vmatpush.bf16.msrb.mxu2 %v1089_v17  ;;  %v1079_v18 = vpack.c.bf16 %v1078_v15, %v1078_v15 }
 0x318   : > { %2293 = vmatmul.msk.bf16.vlgmr.msrb.gmra.mxu2 %vm984_vm2, %v1079_v18 }
 0x31b   : > { %v1175_v21 = vpop.xlane.xlu1 %1174 }
 0x31c   : > { %2560 = vrcp.f32 %v1175_v21 }
 0x322   : > { %v2561_v23 = vpop.eup %2560 }
 0x323   : > { %v1033_v19 = vpop.f32.mrf.mxu0  ;;  %v1177_v24 = vmul.f32 %v2561_v23, %v2557_v6  ;;  %v2390_v23 = vld [vmem:[%s3755_s10] sm:$0xff] }
 0x324   : > { %v1037_v20 = vpack.c.bf16 %v1033_v19, %v1033_v19 }
 0x325   : > { %v1178_v27 = vpack.c.bf16 %v1177_v24, %v1177_v24  ;;  %v1335_v24 = vld [vmem:[%s3756_s11] sm:$0xff] }
 0x326   : > { %2295 = vmatmul.msk.bf16.vlgmr.msra.gmra.mxu0 %vm984_vm2, %v1037_v20 }
 0x32b   : > { %v1035_v22 = vpop.f32.mrf.mxu0 }
 0x32c   : > { %v2391_v22 = vld [vmem:[%s3754_s8 + $0x8] sm:$0xff] }
 0x32d   : > { %1397 = vmatpush.bf16.msra.mxu0 %v2391_v22 }
 0x331   : > { %1398 = vmatpush.bf16.msra.mxu0 %v2390_v23 }
 0x333   : > { %v1180_v25 = vpop.permute.xlu1 %1179 }
 0x334   : > { %v1185_v26 = vsel %vm1020_vm3, %v1180_v25, 0  ;;  %v1336_v25 = vpack.c.bf16 %v1335_v24, %v1335_v24 }
 0x335   : > { %1194 = vmatpush.bf16.msra.mxu2 %v1185_v26  ;;  %v2389_v26 = vld [vmem:[%s3757_s22 + $0x8] sm:$0xff] }
 0x336   : > { %2299 = vmatmul.msk.bf16.vlgmr.msrb.gmra.mxu0 %vm984_vm2, %v1222_v59 }
 0x338   : > { %2297 = vmatmul.msk.bf16.vlgmr.msra.gmra.mxu2 %vm984_vm2, %v1178_v27  ;;  %v2388_v27 = vld [vmem:[%s3758_s23] sm:$0xff] }
 0x339   : > { %1292 = vmatpush.bf16.msrb.mxu2 %v1283_v62 }
 0x346   : > { %2319 = vmatmul.msk.bf16.vlgmr.msra.gmra.mxu0 %vm900_vm1, %v1336_v25 }
 0x39b   : > { %v1100_v32 = vpop.f32.mrf.mxu2 }
 0x39c   : > { %v1104_v33 = vpack.c.bf16 %v1100_v32, %v1100_v32 }
 0x39e   : > { %2294 = vmatmul.msk.bf16.vlgmr.msrb.gmra.mxu3 %vm984_vm2, %v1104_v33 }
 0x39f   : > { %1364 = vmatpush.bf16.msrb.mxu3 %v2389_v26 }
 0x3a3   : > { %v1102_v34 = vpop.f32.mrf.mxu2  ;;  %v1139_v35 = vpop.f32.mrf.mxu0  ;;  %1365 = vmatpush.bf16.msrb.mxu3 %v2388_v27 }
 0x3ab   : > { %v1141_v36 = vpop.f32.mrf.mxu0 }
 0x3b3   : > { %v1240_v37 = vpop.f32.mrf.mxu0 }
 0x3b4   : > { %v1244_v38 = vmul.f32 0.35355338, %v1240_v37 }
 0x3b6   : > { %v1245_v39 = vsel %vm984_vm2, %v1244_v38, -inf }
 0x3b7   : > { %1246 = vmax.xlane.f32.xlu0 %v1245_v39 }
 0x3bb   : > { %v1196_v40 = vpop.f32.mrf.mxu2  ;;  %v1242_v41 = vpop.f32.mrf.mxu0 }
 0x3bc   : > { %v1200_v42 = vpack.c.bf16 %v1196_v40, %v1196_v40 }
 0x3be   : > { %2298 = vmatmul.msk.bf16.vlgmr.msra.gmra.mxu3 %vm984_vm2, %v1200_v42 }
 0x3c3   : > { %v1198_v43 = vpop.f32.mrf.mxu2 }
 0x421   : > { %v1120_v44 = vpop.f32.mrf.mxu3 }
 0x422   : > { %v1140_v51 = vadd.f32 %v1139_v35, %v1120_v44  ;;  %v3516_v35 = vld [vmem:[%s747_s7 + $0x8] sm:$0xff]  ;;  %s3759_s7 = scalar_lea.vmem [#allocation11], %s3379_s6 }
 0x423   : > { %v1333_v40 = vperm.slane %v3516_v35, 1  ;;  %s3760_s16 = smov %s3759_s7 }
 0x424   : > { %v2392_v61 = vld [vmem:[%s3760_s16] sm:$0xff] }
 0x429   : > { %v1122_v45 = vpop.f32.mrf.mxu3 }
 0x42a   : > { %v1247_v46 = vpop.xlane.xlu0 %1246  ;;  %v1375_v45 = vperm.slane %v3442_v7, 5 }
 0x42b   : > { %v1248_v47 = vsub.f32 %v1244_v38, %v1247_v46  ;;  %v1331_v38 = vperm.slane %v3516_v35, 0  ;;  %v1400_v46 = vpop.f32.mrf.mxu0 }
 0x42d   : > { %v1249_v48 = vmul.f32 1.442695, %v1248_v47  ;;  %v1401_v47 = vadd.f32 %v1400_v46, %v1375_v45 }
 0x42f   : > { %2562 = vpow2.f32 %v1249_v48  ;;  %v1439_v48 = vpack.c.bf16 %v1401_v47, %v1401_v47 }
 0x435   : > { %v2563_v49 = vpop.eup %2562 }
 0x436   : > { %v1251_v50 = vsel %vm984_vm2, %v2563_v49, 0.0 }
 0x437   : > { %1252 = vadd.xlane.f32.xlu0 %v1251_v50  ;;  %v1402_v50 = vpop.f32.mrf.mxu0 }
 0x441   : > { %v1216_v52 = vpop.f32.mrf.mxu3 }
 0x442   : > { %v1220_v53 = vadd.f32 %v1216_v52, %v1140_v51  ;;  %v1342_v51 = vperm.slane %v3442_v7, 4 }
 0x449   : > { %v1218_v54 = vpop.f32.mrf.mxu3 }
 0x44b   : > { %1257 = vrot.lane.b32.xlu0 %v1082_v11, %s3010_s28  ;;  %v3011_v11 = vmov 32.0  }
 0x4aa   : > { %v1253_v55 = vpop.xlane.xlu0 %1252 }
 0x4ab   : > { %2564 = vrcp.f32 %v1253_v55 }
 0x4ac   : > { %2566 = vrcp.f32 %v3011_v11 }
 0x4b1   : > { %v2565_v56 = vpop.eup %2564 }
 0x4b2   : > { %v1255_v57 = vmul.f32 %v2565_v56, %v2563_v49  ;;  %v2567_v12 = vpop.eup %2566  ;;  %v1445_v49 = vsel %vm984_vm2, %v1439_v48, 0 }
 0x4b3   : > { %v1306_v13 = vmul.f32 32.0, %v2567_v12  ;;  %vm1310_vm4 = vweird.f32 %v2567_v12  ;;  %1454 = vmatpush.bf16.xpose.msra.mxu2 %v1445_v49 }
 0x4b4   : > { %v1256_v60 = vpack.c.bf16 %v1255_v57, %v1255_v57 }
 0x4b5   : > { %v1307_v14 = vsub.f32 1.0, %v1306_v13 }
 0x4b7   : > { %v1308_v15 = vmul.f32 %v2567_v12, %v1307_v14 }
 0x4b9   : > { %v1309_v16 = vadd.f32 %v2567_v12, %v1308_v15  ;;  %v1434_v15 = vld [vmem:[%s3400_s20] sm:$0xf] }
 0x4bb   : > { %v3498_v17 = vsel %vm1310_vm4, %v2567_v12, %v1309_v16  ;;  %v1583_v16 = vsel %vm1020_vm3, %v1434_v15, 0 }
 0x4bd   : > { %v1258_v58 = vpop.permute.xlu0 %1257 }
 0x4be   : > { %v1263_v59 = vsel %vm1020_vm3, %v1258_v58, 0 }
 0x4bf   : > { %1272 = vmatpush.bf16.msrb.mxu1 %v1263_v59  ;;  %v2393_v59 = vld [vmem:[%s3759_s7 + $0x8] sm:$0xff] }
 0x4c2   : > { %2300 = vmatmul.msk.bf16.vlgmr.msrb.gmra.mxu1 %vm984_vm2, %v1256_v60 }
 0x4c3   : > { %1427 = vmatpush.bf16.msra.mxu1 %v2393_v59 }
 0x4c7   : > { %1428 = vmatpush.bf16.msra.mxu1 %v2392_v61 }
 0x4d2   : > { %2328 = vmatmul.msk.bf16.vlgmr.msra.gmra.mxu1 %vm900_vm1, %v1336_v25 }
 0x53f   : > { %v1274_v63 = vpop.f32.mrf.mxu1 }
 0x540   : > { %v1278_v0 = vpack.c.bf16 %v1274_v63, %v1274_v63 }
 0x542   : > { %2301 = vmatmul.msk.bf16.vlgmr.msrb.gmra.mxu2 %vm984_vm2, %v1278_v0  ;;  %v1499_v0 = vunpack.c.l.b16 %v1439_v48 }
 0x547   : > { %v1276_v1 = vpop.f32.mrf.mxu1 }
 0x548   : > { %v1500_v1 = vpack.c.b16 %v1499_v0, %v1499_v0 }
 0x5c5   : > { %v1294_v3 = vpop.f32.mrf.mxu2 }
 0x5c6   : > { %v1298_v4 = vadd.f32 %v1294_v3, %v1220_v53 }
 0x5c8   : > { %v1300_v6 = vadd.f32 %v1299_v2, %v1298_v4 }
 0x5ca   : > { %v1301_v8 = vadd.f32 %v1300_v6, %v3434_v5 }
 0x5cc   : > { %v1302_v9 = vsel %vm900_vm1, %v1301_v8, 0.0 }
 0x5cd   : > { %v1296_v10 = vpop.f32.mrf.mxu2  ;;  %1303 = vadd.xlane.f32.xlu2 %v1302_v9  ;;  %v1408_v9 = vperm.slane %v3442_v7, 6 }
 0x5ce   : > { %v1430_v10 = vpop.f32.mrf.mxu1 }
 0x5cf   : > { %v1431_v11 = vadd.f32 %v1430_v10, %v1408_v9 }
 0x5d1   : > { %v1440_v12 = vpack.c.bf16 %v1431_v11, %v1431_v11 }
 0x5d3   : > { %v1477_v13 = vsel %vm1020_vm3, %v1440_v12, 0 }
 0x5d4   : > { %1486 = vmatpush.bf16.msra.mxu3 %v1477_v13 }
 0x5d6   : > { %v1432_v14 = vpop.f32.mrf.mxu1 }
 0x640   : > { %v1304_v5 = vpop.xlane.xlu2 %1303 }
 0x641   : > { %v1312_v18 = vmul.f32 %v3498_v17, %v1304_v5 }
 0x643   : > { %v1313_v19 = vsub.f32 %v1301_v8, %v1312_v18 }
 0x645   : > { %v1314_v20 = vmul.f32 %v1313_v19, %v1313_v19 }
 0x647   : > { %v1315_v21 = vsel %vm900_vm1, %v1314_v20, 0.0 }
 0x648   : > { %1316 = vadd.xlane.f32.xlu1 %v1315_v21 }
 0x6bb   : > { %v1317_v28 = vpop.xlane.xlu1 %1316 }
 0x6bc   : > { %v1318_v29 = vmul.f32 %v1317_v28, %v3498_v17 }
 0x6be   : > { %v1319_v30 = vadd.f32 1e-05, %v1318_v29 }
 0x6c0   : > { %2568 = vrsqrt.f32 %v1319_v30  ;;  %vm1326_vm6 = vweird.f32 %v1319_v30 }
 0x6c6   : > { %v2569_v31 = vpop.eup %2568 }
 0x6c7   : > { %v1321_v32 = vmul.f32 %v2569_v31, %v1319_v30  ;;  %vm1327_vm5 = vweird.f32 %v2569_v31 }
 0x6c8   : > { %vm1328_vm7 = vmor %vm1326_vm6, %vm1327_vm5 }
 0x6c9   : > { %v1322_v33 = vmul.f32 %v2569_v31, %v1321_v32 }
 0x6cb   : > { %v1323_v34 = vmul.f32 0.5, %v1322_v33 }
 0x6cd   : > { %v1324_v36 = vsub.f32 1.5, %v1323_v34 }
 0x6cf   : > { %v1325_v37 = vmul.f32 %v2569_v31, %v1324_v36 }
 0x6d1   : > { %v1329_v39 = vsel %vm1328_vm7, %v2569_v31, %v1325_v37 }
 0x6d2   : > { %v1330_v41 = vmul.f32 %v1329_v39, %v1313_v19 }
 0x6d4   : > { %v1332_v42 = vmul.f32 %v1331_v38, %v1330_v41 }
 0x6d6   : > { %v3520_v43 = vadd.f32 %v1333_v40, %v1332_v42  ;;  %v1536_v42 = vunpack.c.l.b16 %v1440_v12 }
 0x6d8   : > { %v1337_v44 = vpack.c.bf16 %v3520_v43, %v3520_v43 }
 0x6da   : > { %2310 = vmatmul.msk.bf16.vlgmr.msrb.gmra.mxu3 %vm900_vm1, %v1337_v44  ;;  %v1537_v44 = vpack.c.b16 %v1536_v42, %v1536_v42 }
 0x6db   : > { %1592 = vmatpush.bf16.msrb.mxu3 %v1583_v16  ;;  %v1435_v16 = vld [vmem:[%s3400_s20 + $0x4] sm:$0xf] }
 0x75d   : > { %v1367_v52 = vpop.f32.mrf.mxu3 }
 0x75e   : > { %v1368_v53 = vadd.f32 %v1367_v52, %v1342_v51 }
 0x760   : > { %v1438_v54 = vpack.c.bf16 %v1368_v53, %v1368_v53 }
 0x762   : > { %v1494_v55 = vunpack.c.l.b16 %v1438_v54  ;;  %2329 = vmatmul.msk.bf16.vlgmr.msra.gmra.mxu2 %vm984_vm2, %v1438_v54 }
 0x764   : > { %v1495_v56 = vpack.c.b16 %v1494_v55, %v1494_v55 }
 0x765   : > { %v1369_v57 = vpop.f32.mrf.mxu3 }
 0x766   : > { %1496 = vrot.lane.b32.xlu1 %v1495_v56, %s3009_s2 }
 0x76e   : > { %1598 = vrot.lane.b32.xlu1 %v1495_v56, %s3008_s0 }
 0x7d8   : > { %v1497_v25 = vpop.permute.xlu1 %1496 }
 0x7e0   : > { %v1599_v28 = vpop.permute.xlu1 %1598 }
 0x7e5   : > { %v1456_v58 = vpop.f32.mrf.mxu2 }
 0x7e6   : > { %v1460_v60 = vmul.f32 0.35355338, %v1456_v58 }
 0x7e8   : > { %v1461_v62 = vsel %vm984_vm2, %v1460_v60, -inf }
 0x7e9   : > { %1462 = vmax.xlane.f32.xlu0 %v1461_v62 }
 0x7ed   : > { %v1458_v63 = vpop.f32.mrf.mxu2 }
 0x7fd   : > { %1600 = vrot.lane.b32.xlu0 %v1500_v1, %s3008_s0 }
 0x805   : > { %1676 = vrot.lane.b32.xlu0 %v1495_v56, %s3010_s28 }
 0x85c   : > { %v1463_v2 = vpop.xlane.xlu0 %1462 }
 0x85d   : > { %v1464_v3 = vsub.f32 %v1460_v60, %v1463_v2 }
 0x85f   : > { %v1465_v4 = vmul.f32 1.442695, %v1464_v3 }
 0x861   : > { %2570 = vpow2.f32 %v1465_v4 }
 0x867   : > { %v2571_v6 = vpop.eup %2570 }
 0x868   : > { %v1467_v8 = vsel %vm984_vm2, %v2571_v6, 0.0 }
 0x869   : > { %1468 = vadd.xlane.f32.xlu2 %v1467_v8 }
 0x86f   : > { %v1601_v19 = vpop.permute.xlu0 %1600 }
 0x870   : > { %v1606_v23 = vsel %vm984_vm2, %v1601_v19, 0 }
 0x877   : > { %v1677_v39 = vpop.permute.xlu0 %1676 }
 0x881   : > { %1501 = vrot.lane.b32.xlu2 %v1500_v1, %s3009_s2 }
 0x889   : > { %1678 = vrot.lane.b32.xlu2 %v1500_v1, %s3010_s28 }
 0x8dc   : > { %v1469_v5 = vpop.xlane.xlu2 %1468 }
 0x8dd   : > { %2572 = vrcp.f32 %v1469_v5  ;;  %v1564_v5 = vsel %vm1020_vm3, %v1435_v16, 0 }
 0x8de   : > { %1573 = vmatpush.bf16.msrb.mxu2 %v1564_v5 }
 0x8e3   : > { %v2573_v18 = vpop.eup %2572 }
 0x8e4   : > { %v1471_v20 = vmul.f32 %v2573_v18, %v2571_v6  ;;  %v1502_v21 = vpop.permute.xlu2 %1501  ;;  %v1436_v18 = vld [vmem:[%s3400_s20 + $0x8] sm:$0xf] }
 0x8e5   : > { %v1507_v22 = vsel %vm984_vm2, %v1502_v21, 0  ;;  %v1660_v19 = vsel %vm1020_vm3, %v1436_v18, 0 }
 0x8e6   : > { %v1472_v24 = vpack.c.bf16 %v1471_v20, %v1471_v20  ;;  %1516 = vmatpush.bf16.xpose.msrb.mxu0 %v1507_v22  ;;  %1669 = vmatpush.bf16.msra.mxu2 %v1660_v19 }
 0x8e8   : > { %2330 = vmatmul.msk.bf16.vlgmr.msra.gmra.mxu3 %vm984_vm2, %v1472_v24 }
 0x8ec   : > { %v1679_v26 = vpop.permute.xlu2 %1678 }
 0x8ed   : > { %v1684_v27 = vsel %vm984_vm2, %v1679_v26, 0  ;;  %2331 = vmatmul.msk.bf16.vlgmr.msrb.gmra.mxu0 %vm984_vm2, %v1497_v25 }
 0x8ee   : > { %1615 = vmatpush.bf16.xpose.msra.mxu0 %v1606_v23  ;;  %1693 = vmatpush.bf16.xpose.msra.mxu3 %v1684_v27 }
 0x8fd   : > { %2335 = vmatmul.msk.bf16.vlgmr.msra.gmra.mxu0 %vm984_vm2, %v1599_v28 }
 0x96a   : > { %v1518_v29 = vpop.f32.mrf.mxu0 }
 0x96b   : > { %v1522_v30 = vmul.f32 0.35355338, %v1518_v29  ;;  %v1488_v31 = vpop.f32.mrf.mxu3 }
 0x96c   : > { %v1492_v32 = vpack.c.bf16 %v1488_v31, %v1488_v31 }
 0x96d   : > { %v1523_v33 = vsel %vm984_vm2, %v1522_v30, -inf }
 0x96e   : > { %2334 = vmatmul.msk.bf16.vlgmr.msrb.gmra.mxu3 %vm984_vm2, %v1492_v32  ;;  %1524 = vmax.xlane.f32.xlu2 %v1523_v33  ;;  %v1437_v32 = vld [vmem:[%s3400_s20 + $0xc] sm:$0xf]  ;;  %s3761_s20 = scalar_lea.vmem [#allocation14], %s3379_s6 }
 0x96f   : > { %v1738_v33 = vsel %vm1020_vm3, %v1437_v32, 0  ;;  %s3762_s21 = smov %s3761_s20 }
 0x972   : > { %v1520_v34 = vpop.f32.mrf.mxu0 }
 0x973   : > { %v1490_v36 = vpop.f32.mrf.mxu3 }
 0x97a   : > { %v1617_v37 = vpop.f32.mrf.mxu0 }
 0x97b   : > { %v1621_v38 = vmul.f32 0.35355338, %v1617_v37 }
 0x97d   : > { %v1622_v40 = vsel %vm984_vm2, %v1621_v38, -inf }
 0x97e   : > { %1623 = vmax.xlane.f32.xlu1 %v1622_v40  ;;  %2338 = vmatmul.msk.bf16.vlgmr.msra.gmra.mxu3 %vm984_vm2, %v1677_v39 }
 0x982   : > { %v1619_v41 = vpop.f32.mrf.mxu0 }
 0x997   : > { %1538 = vrot.lane.b32.xlu1 %v1537_v44, %s3009_s2 }
 0x9e1   : > { %v1525_v45 = vpop.xlane.xlu2 %1524 }
 0x9e2   : > { %v1526_v46 = vsub.f32 %v1522_v30, %v1525_v45  ;;  %v1754_v45 = vperm.slane %v3442_v7, 7  ;;  %v2395_v7 = vld [vmem:[%s3761_s20 + $0x8] sm:$0xff] }
 0x9e4   : > { %v1527_v47 = vmul.f32 1.442695, %v1526_v46 }
 0x9e6   : > { %2574 = vpow2.f32 %v1527_v47 }
 0x9ec   : > { %v2575_v48 = vpop.eup %2574 }
 0x9ed   : > { %v1529_v49 = vsel %vm984_vm2, %v2575_v48, 0.0 }
 0x9ee   : > { %1530 = vadd.xlane.f32.xlu2 %v1529_v49 }
 0x9f1   : > { %v3558_v50 = vpop.f32.mrf.mxu3  ;;  %v1624_v51 = vpop.xlane.xlu1 %1623 }
 0x9f2   : > { %v1625_v53 = vsub.f32 %v1621_v38, %v1624_v51 }
 0x9f4   : > { %v1626_v54 = vmul.f32 1.442695, %v1625_v53 }
 0x9f6   : > { %2576 = vpow2.f32 %v1626_v54 }
 0x9f9   : > { %v1596_v52 = vpop.f32.mrf.mxu3 }
 0x9fc   : > { %v2577_v58 = vpop.eup %2576 }
 0x9fd   : > { %v1628_v62 = vsel %vm984_vm2, %v2577_v58, 0.0 }
 0xa01   : > { %v1695_v55 = vpop.f32.mrf.mxu3 }
 0xa02   : > { %v1699_v56 = vmul.f32 0.35355338, %v1695_v55 }
 0xa04   : > { %v1700_v57 = vsel %vm984_vm2, %v1699_v56, -inf }
 0xa05   : > { %1701 = vmax.xlane.f32.xlu0 %v1700_v57  ;;  %v2394_v57 = vld [vmem:[%s3762_s21] sm:$0xff] }
 0xa06   : > { %1634 = vrot.lane.b32.xlu2 %v1537_v44, %s3008_s0 }
 0xa09   : > { %v1539_v59 = vpop.permute.xlu1 %1538  ;;  %v1697_v60 = vpop.f32.mrf.mxu3 }
 0xa0a   : > { %v1544_v61 = vsel %vm1020_vm3, %v1539_v59, 0  ;;  %v2398_v60 = vld [vmem:[%s3423_s5 + $0x10] sm:$0xff] }
 0xa0b   : > { %1553 = vmatpush.bf16.msrb.mxu1 %v1544_v61 }
 0xa0d   : > { %1629 = vadd.xlane.f32.xlu0 %v1628_v62 }
 0xa61   : > { %v1531_v63 = vpop.xlane.xlu2 %1530 }
 0xa62   : > { %2578 = vrcp.f32 %v1531_v63 }
 0xa68   : > { %v2579_v0 = vpop.eup %2578 }
 0xa69   : > { %v1533_v1 = vmul.f32 %v2579_v0, %v2575_v48  ;;  %v1635_v2 = vpop.permute.xlu2 %1634 }
 0xa6a   : > { %v1640_v3 = vsel %vm1020_vm3, %v1635_v2, 0 }
 0xa6b   : > { %v1534_v4 = vpack.c.bf16 %v1533_v1, %v1533_v1  ;;  %1649 = vmatpush.bf16.msra.mxu1 %v1640_v3 }
 0xa6d   : > { %2332 = vmatmul.msk.bf16.vlgmr.msrb.gmra.mxu1 %vm984_vm2, %v1534_v4  ;;  %v1779_v4 = vperm.slane %v3516_v35, 2 }
 0xa6f   : > { %1747 = vmatpush.bf16.msrb.mxu1 %v1738_v33 }
 0xa78   : > { %v1702_v6 = vpop.xlane.xlu0 %1701 }
 0xa79   : > { %v1703_v8 = vsub.f32 %v1699_v56, %v1702_v6 }
 0xa7b   : > { %v1704_v9 = vmul.f32 1.442695, %v1703_v8  ;;  %v1781_v8 = vperm.slane %v3516_v35, 3 }
 0xa7d   : > { %2580 = vpow2.f32 %v1704_v9 }
 0xa80   : > { %v1630_v10 = vpop.xlane.xlu0 %1629 }
 0xa81   : > { %2582 = vrcp.f32 %v1630_v10 }
 0xa83   : > { %v2581_v11 = vpop.eup %2580 }
 0xa84   : > { %v1706_v12 = vsel %vm984_vm2, %v2581_v11, 0.0 }
 0xa85   : > { %1707 = vadd.xlane.f32.xlu0 %v1706_v12 }
 0xa87   : > { %v2583_v13 = vpop.eup %2582 }
 0xa88   : > { %v1632_v14 = vmul.f32 %v2583_v13, %v2577_v58  ;;  %v2397_v13 = vld [vmem:[%s3423_s5 + $0x8] sm:$0xff] }
 0xa8a   : > { %v1633_v15 = vpack.c.bf16 %v1632_v14, %v1632_v14  ;;  %v2396_v14 = vld [vmem:[%s3423_s5] sm:$0xff] }
 0xa8c   : > { %2336 = vmatmul.msk.bf16.vlgmr.msra.gmra.mxu1 %vm984_vm2, %v1633_v15  ;;  %v1788_v15 = vperm.slane %v3516_v35, 6 }
 0xa99   : > { %1712 = vrot.lane.b32.xlu0 %v1537_v44, %s3010_s28  ;;  %s2880_s28 = scalar_lea.hbm %s3764_s1, 16 }
 0xaea   : > { %v1555_v20 = vpop.f32.mrf.mxu1 }
 0xaeb   : > { %v1559_v21 = vpack.c.bf16 %v1555_v20, %v1555_v20 }
 0xaed   : > { %2333 = vmatmul.msk.bf16.vlgmr.msrb.gmra.mxu2 %vm984_vm2, %v1559_v21  ;;  %v1827_v21 = vperm.slane %v3516_v35, 7 }
 0xaee   : > { %1810 = vmatpush.bf16.msrb.mxu2 %v2395_v7 }
 0xaf2   : > { %v1557_v22 = vpop.f32.mrf.mxu1  ;;  %1811 = vmatpush.bf16.msrb.mxu2 %v2394_v57 }
 0xaf8   : > { %v1708_v23 = vpop.xlane.xlu0 %1707 }
 0xaf9   : > { %2584 = vrcp.f32 %v1708_v23 }
 0xaff   : > { %v2585_v24 = vpop.eup %2584 }
 0xb00   : > { %v1710_v26 = vmul.f32 %v2585_v24, %v2581_v11 }
 0xb02   : > { %v1711_v30 = vpack.c.bf16 %v1710_v26, %v1710_v26 }
 0xb09   : > { %v1651_v25 = vpop.f32.mrf.mxu1 }
 0xb0a   : > { %v1655_v27 = vpack.c.bf16 %v1651_v25, %v1651_v25 }
 0xb0b   : > { %v1713_v28 = vpop.permute.xlu0 %1712 }
 0xb0c   : > { %v1718_v29 = vsel %vm1020_vm3, %v1713_v28, 0  ;;  %2337 = vmatmul.msk.bf16.vlgmr.msra.gmra.mxu2 %vm984_vm2, %v1655_v27 }
 0xb0d   : > { %1727 = vmatpush.bf16.msrb.mxu0 %v1718_v29 }
 0xb10   : > { %2339 = vmatmul.msk.bf16.vlgmr.msrb.gmra.mxu0 %vm984_vm2, %v1711_v30 }
 0xb11   : > { %v1653_v31 = vpop.f32.mrf.mxu1 }
 0xb70   : > { %v1575_v34 = vpop.f32.mrf.mxu2 }
 0xb71   : > { %v1595_v38 = vadd.f32 %v3558_v50, %v1575_v34 }
 0xb78   : > { %v1577_v36 = vpop.f32.mrf.mxu2 }
 0xb8d   : > { %v1729_v37 = vpop.f32.mrf.mxu0 }
 0xb8e   : > { %v1733_v39 = vpack.c.bf16 %v1729_v37, %v1729_v37 }
 0xb8f   : > { %v1671_v40 = vpop.f32.mrf.mxu2 }
 0xb90   : > { %v1675_v41 = vadd.f32 %v1671_v40, %v1595_v38  ;;  %2340 = vmatmul.msk.bf16.vlgmr.msrb.gmra.mxu1 %vm984_vm2, %v1733_v39 }
 0xb95   : > { %v1731_v42 = vpop.f32.mrf.mxu0 }
 0xb96   : > { %v1892_v42 = vperm.slane %v3516_v35, 4 }
 0xb97   : > { %v1673_v44 = vpop.f32.mrf.mxu2 }
 0xc0d   : > { %v1749_v46 = vpop.f32.mrf.mxu1 }
 0xc0e   : > { %v1753_v47 = vadd.f32 %v1749_v46, %v1675_v41 }
 0xc10   : > { %v1755_v48 = vadd.f32 %v1754_v45, %v1753_v47  ;;  %v1894_v45 = vperm.slane %v3516_v35, 5 }
 0xc12   : > { %v1756_v49 = vadd.f32 %v1755_v48, %v3520_v43  ;;  %v2399_v43 = vld [vmem:[%s3423_s5 + $0x18] sm:$0xff]  ;;  %s3763_s5 = sld [smem:[#allocation29_spill]] }
 0xc13   : > { %1860 = vmatpush.bf16.msrb.mxu3 %v2399_v43 }
 0xc14   : > { %v1757_v51 = vsel %vm900_vm1, %v1756_v49, 0.0 }
 0xc15   : > { %v1751_v50 = vpop.f32.mrf.mxu1  ;;  %1758 = vadd.xlane.f32.xlu1 %v1757_v51 }
 0xc17   : > { %1861 = vmatpush.bf16.msrb.mxu3 %v2398_v60 }
 0xc18   : > { %s2368_s6 = sshll.u32 %s3763_s5, 3 }
 0xc19   : > { %s1908_s13 = scalar_lea.hbm %s3764_s1, %s2368_s6 }
 0xc1a   : > { %s1912_s3 = sshll.u32 %s1908_s13, 4  ;;  %s1913_s3 = int_to_ptr.hbm [resolvable:$true] %s1912_s3 }
 0xc1b   : > { %1862 = vmatpush.bf16.msrb.mxu3 %v2397_v13  ;;  %s2874_s24 = sshra.s32 %s1913_s3, 4  ;;  %s2875_s24 = int_to_ptr.hbm [resolvable:$true] %s2874_s24 }
 0xc1c   : > { %s2876_s14 = scalar_lea.hbm %s2875_s24, 8  ;;  %p2881_p5 = scmp.lt.s32.totalorder %s2875_s24, %s3764_s1 }
 0xc1d   : > { %p2877_p12 = scmp.ne.s32.totalorder %s2875_s24, %s2876_s14  ;;  %p2882_p10 = scmp.lt.s32.totalorder %s2880_s28, %s2876_s14 }
 0xc1f   : > { %1863 = vmatpush.bf16.msrb.mxu3 %v2396_v14  ;;  %p2878_p13 = pnand %p2877_p12, %p3205_p8  ;;  %p2883_p1 = por %p2882_p10, %p2881_p5 }
 0xc21   : > { %p2879_p0 = pneg %p2878_p13 }
 0xc23   : > { %p2884_p3 = pnand %p2883_p1, %p2879_p0 }
 0xc88   : > { %v1759_v52 = vpop.xlane.xlu1 %1758 }
 0xc89   : > { %v1760_v53 = vmul.f32 %v1759_v52, %v3498_v17 }
 0xc8b   : > { %v1761_v54 = vsub.f32 %v1756_v49, %v1760_v53 }
 0xc8d   : > { %v1762_v55 = vmul.f32 %v1761_v54, %v1761_v54 }
 0xc8f   : > { %v1763_v56 = vsel %vm900_vm1, %v1762_v55, 0.0 }
 0xc90   : > { %1764 = vadd.xlane.f32.xlu2 %v1763_v56 }
 0xd03   : > { %v1765_v58 = vpop.xlane.xlu2 %1764 }
 0xd04   : > { %v1766_v59 = vmul.f32 %v1765_v58, %v3498_v17 }
 0xd06   : > { %v1767_v61 = vadd.f32 1e-05, %v1766_v59 }
 0xd08   : > { %2586 = vrsqrt.f32 %v1767_v61  ;;  %vm1774_vm9 = vweird.f32 %v1767_v61 }
 0xd0e   : > { %v2587_v62 = vpop.eup %2586 }
 0xd0f   : > { %v1769_v63 = vmul.f32 %v2587_v62, %v1767_v61  ;;  %vm1775_vm8 = vweird.f32 %v2587_v62 }
 0xd10   : > { %vm1776_vm10 = vmor %vm1774_vm9, %vm1775_vm8 }
 0xd11   : > { %v1770_v0 = vmul.f32 %v2587_v62, %v1769_v63 }
 0xd13   : > { %v1771_v1 = vmul.f32 0.5, %v1770_v0 }
 0xd15   : > { %v1772_v2 = vsub.f32 1.5, %v1771_v1 }
 0xd17   : > { %v1773_v3 = vmul.f32 %v2587_v62, %v1772_v2 }
 0xd19   : > { %v1777_v6 = vsel %vm1776_vm10, %v2587_v62, %v1773_v3 }
 0xd1a   : > { %v1778_v9 = vmul.f32 %v1777_v6, %v1761_v54 }
 0xd1c   : > { %v1780_v10 = vmul.f32 %v1779_v4, %v1778_v9 }
 0xd1e   : > { %v1782_v11 = vadd.f32 %v1781_v8, %v1780_v10 }
 0xd20   : > { %v1783_v12 = vpack.c.bf16 %v1782_v11, %v1782_v11 }
 0xd22   : > { %2349 = vmatmul.msk.bf16.vlgmr.msrb.gmra.mxu2 %vm900_vm1, %v1783_v12 }
 0xda5   : > { %v1813_v16 = vpop.f32.mrf.mxu2 }
 0xda6   : > { %v1814_v5 = vadd.f32 %v1813_v16, %v1788_v15 }
 0xda8   : > { %v1817_v18 = vmax.f32 %v1814_v5, 0.0 }
 0xdaa   : > { %v1818_v19 = vpack.c.bf16 %v1817_v18, %v1817_v18 }
 0xdac   : > { %2366 = vmatmul.msk.bf16.vlgmr.msrb.gmra.mxu3 %vm1852_vm11, %v1818_v19 }
 0xdad   : > { %v1815_v20 = vpop.f32.mrf.mxu2 }
 0xe2f   : > { %v1865_v22 = vpop.f32.mrf.mxu3 }
 0xe30   : > { %v1866_v23 = vadd.f32 %v1865_v22, %v1827_v21 }
 0xe32   : > { %v1869_v24 = vadd.f32 %v1866_v23, %v1782_v11 }
 0xe34   : > { %v1870_v25 = vsel %vm900_vm1, %v1869_v24, 0.0 }
 0xe35   : > { %1871 = vadd.xlane.f32.xlu0 %v1870_v25 }
 0xe37   : > { %v1867_v26 = vpop.f32.mrf.mxu3 }
 0xea8   : > { %v1872_v27 = vpop.xlane.xlu0 %1871 }
 0xea9   : > { %v1873_v28 = vmul.f32 %v1872_v27, %v3498_v17 }
 0xeab   : > { %v1874_v29 = vsub.f32 %v1869_v24, %v1873_v28 }
 0xead   : > { %v1875_v30 = vmul.f32 %v1874_v29, %v1874_v29 }
 0xeaf   : > { %v1876_v31 = vsel %vm900_vm1, %v1875_v30, 0.0 }
 0xeb0   : > { %1877 = vadd.xlane.f32.xlu1 %v1876_v31 }
 0xf23   : > { %v1878_v32 = vpop.xlane.xlu1 %1877 }
 0xf24   : > { %v1879_v33 = vmul.f32 %v1878_v32, %v3498_v17 }
 0xf26   : > { %v1880_v34 = vadd.f32 1e-05, %v1879_v33 }
 0xf28   : > { %2588 = vrsqrt.f32 %v1880_v34  ;;  %vm1887_vm13 = vweird.f32 %v1880_v34 }
 0xf2e   : > { %v2589_v36 = vpop.eup %2588 }
 0xf2f   : > { %v1882_v37 = vmul.f32 %v2589_v36, %v1880_v34  ;;  %vm1888_vm12 = vweird.f32 %v2589_v36 }
 0xf30   : > { %vm1889_vm14 = vmor %vm1887_vm13, %vm1888_vm12 }
 0xf31   : > { %v1883_v38 = vmul.f32 %v2589_v36, %v1882_v37 }
 0xf33   : > { %v1884_v39 = vmul.f32 0.5, %v1883_v38 }
 0xf35   : > { %v1885_v40 = vsub.f32 1.5, %v1884_v39 }
 0xf37   : > { %v1886_v41 = vmul.f32 %v2589_v36, %v1885_v40 }
 0xf39   : > { %v1890_v17 = vsel %vm1889_vm14, %v2589_v36, %v1886_v41 }
 0xf3a   : > { %v1891_v44 = vmul.f32 %v1890_v17, %v1874_v29 }
 0xf3c   : > { %v1893_v46 = vmul.f32 %v1892_v42, %v1891_v44 }
 0xf3e   : > { %v1895_v47 = vadd.f32 %v1894_v45, %v1893_v46 }
 0xf40   : > { %1896 = vst.msk [vmem:[%s3427_s15] sm:$0xff] %vm900_vm1, %v1895_v47 }
 0xf41   : > { %2887 = shalt.err (!%p2884_p3)
}
 0xf42   : > { %2418 = dma.vmem_to_hbm [thread:$0]  (%p3205_p8), %s1911_s26, 128, %s1913_s3, %s1898_s18  }
 0xf43 PF: > { %s3766_s27 = sld [smem:[#allocation31_spill]] }
 0xf44   : > { %s3767_s15 = sld [smem:[#allocation27_spill]] }
 0xf49   : > { %p2453_p6 = scmp.ge.s32.totalorder %s3766_s27, 2 }
 0xf4a   : > { %s1924_s22 = sand.u32 1, %s3767_s15  }
 0xf4b   : > { %p2449_p9 = pnand %p2453_p6, %p3212_p2  ;;  %s1925_s23 = scalar_lea.sflag [#allocation4], %s1924_s22 }
 0xf4d   : > { %p2450_p4 = pneg %p2449_p9 }
 0xf4f   : > { %2957 = dma.done.wait (%p2450_p4), %s1925_s23, 128  }
 0xf50   : > { %2959 = vsyncadd (%p2450_p4), %s1925_s23, 4294967168  ;;  %s41_s18 = sadd.s32 1, %s3766_s27   ;;  %s3769_s25 = sld [smem:[#allocation25_spill]] }
 0xf51   : > { %p38_p7 = scmp.ge.s32.totalorder %s41_s18, 6   ;;  %s3770_s26 = sld [smem:[#allocation26_spill]] }
 0xf52   : > { %s3771_s27 = sld [smem:[#allocation34_spill]]  ;;  %s3776_s28 = smov %s2978_s29 }
 0xf53   : > { %s3772_s7 = sld [smem:[#allocation35_spill]]  ;;  %s3777_s29 = smov %s2982_s30 }
 0xf54   : > { %s3773_s14 = sld [smem:[#allocation30_spill]]  ;;  %s3779_s15 = smov %s2998_s17 }
 0xf55   : > { %s3774_s16 = sld [smem:[#allocation32_spill]] }
 0xf56   : > { %s3775_s20 = sld [smem:[#allocation33_spill]] }
 0xf58   :  { %40 = sbr.rel (!%p38_p7) target bundleno = 30 (0x1e), region = 229 }
 0xf59   : > { %s3778_s30 = smov %s3772_s7 }
 0xf5c   : > { %s3780_s17 = smov %s3775_s20 }
 0xf5d   :  { %1931 = vsyncpa [#allocation3], 1 }
 0xf5e   :  { %1933 = vsyncpa [#allocation3 + $0x1], 1 }
 0xf5f   :  { %1934 = vsyncpa [#allocation6], 1 }
 0xf60   :  { %1936 = vsyncpa [#allocation6 + $0x1], 1 }
 0xf61   :  { %1937 = vsyncpa [#allocation9], 1 }
 0xf62   :  { %1939 = vsyncpa [#allocation9 + $0x1], 1 }
 0xf63   :  { %1940 = vsyncpa [#allocation12], 1 }
 0xf64   :  { %1942 = vsyncpa [#allocation12 + $0x1], 1 }
 0xf65   :  { %1943 = vsyncpa [#allocation15], 1 }
 0xf66   :  { %1945 = vsyncpa [#allocation15 + $0x1], 1 }
 0xf67   :  { %1946 = vsyncpa [#allocation4], 1 }
 0xf68   :  { %1948 = vsyncpa [#allocation4 + $0x1], 1 }

</bundles_post_ra>
